<compile_context>
chip_gen: v6e
topology: v6e:2x2x1
jax: 0.10.0
libtpu: 0.0.40
codegen_flags: <defaults>
</compile_context>

<pallas_src>
import numpy as np
import jax
import jax.numpy as jnp
from jax.experimental import pallas as pl
from jax.experimental.pallas import tpu as pltpu

FEATURE_FREQUENCIES = (1.0, 2.0, 4.0, 8.0, 16.0, 32.0)
HIDDEN_FEATURES = (256, 256)                      # module default
IN_FEATURES = 2 * (1 + len(FEATURE_FREQUENCIES))  # 14

# Per-feature-row coefficients (passed into the kernel as inputs):
#   rows 0..6  -> depth features     [d, sin(1*d), sin(2*d), ..., sin(32*d)]
#   rows 7..13 -> amplitude features [a, sin(1*a), sin(2*a), ..., sin(32*a)]
_coef_d = np.zeros((IN_FEATURES, 1), np.float32)
_coef_a = np.zeros((IN_FEATURES, 1), np.float32)
_sin_mask = np.zeros((IN_FEATURES, 1), np.float32)
_coef_d[0, 0] = 1.0
_coef_a[1 + len(FEATURE_FREQUENCIES), 0] = 1.0
for _i, _f in enumerate(FEATURE_FREQUENCIES):
    _coef_d[1 + _i, 0] = _f
    _coef_a[2 + len(FEATURE_FREQUENCIES) + _i, 0] = _f
    _sin_mask[1 + _i, 0] = 1.0
    _sin_mask[2 + len(FEATURE_FREQUENCIES) + _i, 0] = 1.0


def _activity_kernel(da_ref, cd_ref, ca_ref, cm_ref,
                     w1_ref, b1_ref, w2_ref, b2_ref, w3_ref, b3_ref,
                     out_ref):
    # da_ref: [2, TB]   row 0 = depths, row 1 = amplitudes (batch on lanes)
    d = da_ref[0:1, :]                      # [1, TB]
    a = da_ref[1:2, :]                      # [1, TB]

    coef_d = cd_ref[...]                    # [14, 1]
    coef_a = ca_ref[...]                    # [14, 1]
    sin_mask = cm_ref[...]                  # [14, 1]

    # Feature rows without any concatenate: pre[k] = c_d[k]*d + c_a[k]*a,
    # then blend sin(pre) vs pre (rows 0 and 7 are the raw inputs).
    pre = coef_d * d + coef_a * a                          # [14, TB]
    x = sin_mask * jnp.sin(pre) + (1.0 - sin_mask) * pre   # [14, TB]

    # MLP (transposed): h^T = W @ x^T + b, W in PyTorch [out, in] layout.
    h1 = jnp.dot(w1_ref[...], x, preferred_element_type=jnp.float32) + b1_ref[...]
    h1 = jnp.maximum(h1, 0.0)                              # [256, TB]
    h2 = jnp.dot(w2_ref[...], h1, preferred_element_type=jnp.float32) + b2_ref[...]
    h2 = jnp.maximum(h2, 0.0)                              # [256, TB]
    logits = jnp.dot(w3_ref[...], h2,
                     preferred_element_type=jnp.float32) + b3_ref[...]  # [1, TB]

    out_ref[...] = jax.nn.sigmoid(logits)                  # lane-dense [1, TB]


def _round_up(x, m):
    return (x + m - 1) // m * m


@jax.jit
def _forward_padded(da, w1, b1, w2, b2, w3, b3):
    """da: [2, Bp] with Bp a multiple of the (implied) tile size."""
    Bp = da.shape[1]
    TB = min(512, Bp)
    num_tiles = Bp // TB

    cd = jnp.asarray(_coef_d)
    ca = jnp.asarray(_coef_a)
    cm = jnp.asarray(_sin_mask)

    def const_spec(arr):
        # Constant block index => parameter stays VMEM-resident, single DMA.
        return pl.BlockSpec(arr.shape, lambda i: (0, 0))

    out = pl.pallas_call(
        _activity_kernel,
        out_shape=jax.ShapeDtypeStruct((1, Bp), jnp.float32),
        grid=(num_tiles,),
        in_specs=[
            pl.BlockSpec((2, TB), lambda i: (0, i)),   # activations, pipelined
            const_spec(cd), const_spec(ca), const_spec(cm),
            const_spec(w1), const_spec(b1),
            const_spec(w2), const_spec(b2),
            const_spec(w3), const_spec(b3),
        ],
        out_specs=pl.BlockSpec((1, TB), lambda i: (0, i)),
        compiler_params=pltpu.CompilerParams(
            dimension_semantics=("parallel",)),        # megacore on v7x
    )(da, cd, ca, cm, w1, b1, w2, b2, w3, b3)
    return out


def activity_network_forward(depths, amplitudes, w1, b1, w2, b2, w3, b3):
    """ActivityNetwork.forward: [B] depths, [B] amplitudes -> [B] probabilities."""
    B = depths.shape[0]
    TB = min(512, _round_up(max(B, 1), 128))   # lane-aligned batch tile
    Bp = _round_up(B, TB)

    da = jnp.stack([depths, amplitudes], axis=0).astype(jnp.float32)  # [2, B]
    da = jnp.pad(da, ((0, 0), (0, Bp - B)))                           # [2, Bp]

    out = _forward_padded(da, w1, b1, w2, b2, w3, b3)                 # [1, Bp]
    return out[0, :B]                                                 # [B]


def init_params(key, in_features=IN_FEATURES,
                layer_features=tuple(HIDDEN_FEATURES) + (1,)):
    """PyTorch-Linear-style init: U(-1/sqrt(fan_in), 1/sqrt(fan_in)).

    Weights are stored in PyTorch [out, in] layout (what the transposed
    kernel consumes directly); biases as [out, 1] column vectors.
    """
    params = []
    feats = [in_features] + list(layer_features)
    for i in range(len(feats) - 1):
        fan_in, fan_out = feats[i], feats[i + 1]
        key, kw, kb = jax.random.split(key, 3)
        bound = 1.0 / (fan_in ** 0.5)
        w = jax.random.uniform(kw, (fan_out, fan_in), jnp.float32, -bound, bound)
        b = jax.random.uniform(kb, (fan_out, 1), jnp.float32, -bound, bound)
        params += [w, b]
    return params


def _reference(depths, amplitudes, w1, b1, w2, b2, w3, b3):
    fs = jnp.asarray(FEATURE_FREQUENCIES, jnp.float32)
    feats = ([depths] + [jnp.sin(f * depths) for f in fs]
             + [amplitudes] + [jnp.sin(f * amplitudes) for f in fs])
    x = jnp.stack(feats, axis=1)                       # [B, 14]
    hp = jax.lax.Precision.HIGHEST
    h1 = jnp.maximum(jnp.dot(x, w1.T, precision=hp) + b1[:, 0], 0.0)
    h2 = jnp.maximum(jnp.dot(h1, w2.T, precision=hp) + b2[:, 0], 0.0)
    logits = jnp.dot(h2, w3.T, precision=hp) + b3[:, 0]
    return jax.nn.sigmoid(logits[:, 0])


if __name__ == "__main__":
    key = jax.random.PRNGKey(0)
    kd, ka, kp = jax.random.split(key, 3)

    # Small primary test (B=8), matching the module's 1-D [B] inputs.
    B = 8
    depths = jax.random.normal(kd, (B,), jnp.float32)
    amplitudes = jax.random.normal(ka, (B,), jnp.float32)
    w1, b1, w2, b2, w3, b3 = init_params(kp)

    probs = activity_network_forward(depths, amplitudes, w1, b1, w2, b2, w3, b3)
    probs = jax.block_until_ready(probs)
    ref = _reference(depths, amplitudes, w1, b1, w2, b2, w3, b3)
    assert probs.shape == (B,)
    # Tolerance allows for MXU-vs-XLA matmul precision differences; outputs
    # are sigmoid probabilities in [0, 1] so 2e-3 abs still catches any
    # structural error.
    assert jnp.allclose(probs, ref, atol=2e-3, rtol=2e-3), (probs, ref)

    # Secondary test exercising batch tiling + padding (grid of 3 tiles of 512).
    B2 = 1100
    kd2, ka2 = jax.random.split(jax.random.PRNGKey(1))
    depths2 = jax.random.normal(kd2, (B2,), jnp.float32)
    amplitudes2 = jax.random.normal(ka2, (B2,), jnp.float32)
    probs2 = jax.block_until_ready(
        activity_network_forward(depths2, amplitudes2, w1, b1, w2, b2, w3, b3))
    ref2 = _reference(depths2, amplitudes2, w1, b1, w2, b2, w3, b3)
    assert probs2.shape == (B2,)
    assert jnp.allclose(probs2, ref2, atol=2e-3, rtol=2e-3)

    print("KERNEL_OK")
</pallas_src>

<mosaic_0001>
module attributes {stable_mosaic.version = 11 : i64} {
  func.func @_activity_kernel(%arg0: i32, %arg1: memref<2x128xf32, #tpu.memory_space<vmem>>, %arg2: memref<14x1xf32, #tpu.memory_space<vmem>>, %arg3: memref<14x1xf32, #tpu.memory_space<vmem>>, %arg4: memref<14x1xf32, #tpu.memory_space<vmem>>, %arg5: memref<256x14xf32, #tpu.memory_space<vmem>>, %arg6: memref<256x1xf32, #tpu.memory_space<vmem>>, %arg7: memref<256x256xf32, #tpu.memory_space<vmem>>, %arg8: memref<256x1xf32, #tpu.memory_space<vmem>>, %arg9: memref<1x256xf32, #tpu.memory_space<vmem>>, %arg10: memref<1x1xf32, #tpu.memory_space<vmem>>, %arg11: memref<1x128xf32, #tpu.memory_space<vmem>>) attributes {dimension_semantics = [#tpu.dimension_semantics<parallel>], iteration_bounds = array<i64: 1>, scalar_prefetch = 0 : i64, scratch_operands = 0 : i64, tpu.core_type = #tpu.core_type<tc>, window_params = [{transform_indices = @transform_0, window_bounds = array<i64: 2, 128>}, {pipeline_mode = #tpu.pipeline_mode<synchronous>, transform_indices = @transform_1, window_bounds = array<i64: 14, 1>}, {pipeline_mode = #tpu.pipeline_mode<synchronous>, transform_indices = @transform_2, window_bounds = array<i64: 14, 1>}, {pipeline_mode = #tpu.pipeline_mode<synchronous>, transform_indices = @transform_3, window_bounds = array<i64: 14, 1>}, {pipeline_mode = #tpu.pipeline_mode<synchronous>, transform_indices = @transform_4, window_bounds = array<i64: 256, 14>}, {pipeline_mode = #tpu.pipeline_mode<synchronous>, transform_indices = @transform_5, window_bounds = array<i64: 256, 1>}, {pipeline_mode = #tpu.pipeline_mode<synchronous>, transform_indices = @transform_6, window_bounds = array<i64: 256, 256>}, {pipeline_mode = #tpu.pipeline_mode<synchronous>, transform_indices = @transform_7, window_bounds = array<i64: 256, 1>}, {pipeline_mode = #tpu.pipeline_mode<synchronous>, transform_indices = @transform_8, window_bounds = array<i64: 1, 256>}, {pipeline_mode = #tpu.pipeline_mode<synchronous>, transform_indices = @transform_9, window_bounds = array<i64: 1, 1>}, {transform_indices = @transform_10, window_bounds = array<i64: 1, 128>}]} {
    %c0 = arith.constant 0 : index
    %c0_0 = arith.constant 0 : index
    %0 = vector.load %arg1[%c0, %c0_0] : memref<2x128xf32, #tpu.memory_space<vmem>>, vector<1x128xf32>
    %c1 = arith.constant 1 : index
    %c0_1 = arith.constant 0 : index
    %1 = vector.load %arg1[%c1, %c0_1] : memref<2x128xf32, #tpu.memory_space<vmem>>, vector<1x128xf32>
    %c0_2 = arith.constant 0 : index
    %c0_3 = arith.constant 0 : index
    %2 = vector.load %arg2[%c0_2, %c0_3] : memref<14x1xf32, #tpu.memory_space<vmem>>, vector<14x1xf32>
    %c0_4 = arith.constant 0 : index
    %c0_5 = arith.constant 0 : index
    %3 = vector.load %arg3[%c0_4, %c0_5] : memref<14x1xf32, #tpu.memory_space<vmem>>, vector<14x1xf32>
    %c0_6 = arith.constant 0 : index
    %c0_7 = arith.constant 0 : index
    %4 = vector.load %arg4[%c0_6, %c0_7] : memref<14x1xf32, #tpu.memory_space<vmem>>, vector<14x1xf32>
    %5 = vector.broadcast %2 : vector<14x1xf32> to vector<14x128xf32>
    %6 = vector.broadcast %0 : vector<1x128xf32> to vector<14x128xf32>
    %7 = arith.mulf %5, %6 : vector<14x128xf32>
    %8 = vector.broadcast %3 : vector<14x1xf32> to vector<14x128xf32>
    %9 = vector.broadcast %1 : vector<1x128xf32> to vector<14x128xf32>
    %10 = arith.mulf %8, %9 : vector<14x128xf32>
    %11 = arith.addf %7, %10 : vector<14x128xf32>
    %12 = math.sin %11 : vector<14x128xf32>
    %13 = vector.broadcast %4 : vector<14x1xf32> to vector<14x128xf32>
    %14 = arith.mulf %13, %12 : vector<14x128xf32>
    %cst = arith.constant 1.000000e+00 : f32
    %15 = vector.broadcast %cst : f32 to vector<14x1xf32>
    %16 = arith.subf %15, %4 : vector<14x1xf32>
    %17 = vector.broadcast %16 : vector<14x1xf32> to vector<14x128xf32>
    %18 = arith.mulf %17, %11 : vector<14x128xf32>
    %19 = arith.addf %14, %18 : vector<14x128xf32>
    %c0_8 = arith.constant 0 : index
    %c0_9 = arith.constant 0 : index
    %20 = vector.load %arg5[%c0_8, %c0_9] : memref<256x14xf32, #tpu.memory_space<vmem>>, vector<256x14xf32>
    %cst_10 = arith.constant dense<0.000000e+00> : vector<256x128xf32>
    %21 = tpu.matmul %20, %19, %cst_10 {dimension_numbers = #tpu.dot_dimension_numbers<[1], [0], [0], [1], [0, 0, 1, 1], [], []>} : vector<256x14xf32>, vector<14x128xf32>, vector<256x128xf32> -> vector<256x128xf32>
    %c0_11 = arith.constant 0 : index
    %c0_12 = arith.constant 0 : index
    %22 = vector.load %arg6[%c0_11, %c0_12] : memref<256x1xf32, #tpu.memory_space<vmem>>, vector<256x1xf32>
    %23 = vector.broadcast %22 : vector<256x1xf32> to vector<256x128xf32>
    %24 = arith.addf %21, %23 : vector<256x128xf32>
    %cst_13 = arith.constant 0.000000e+00 : f32
    %25 = vector.broadcast %cst_13 : f32 to vector<256x128xf32>
    %26 = arith.maximumf %24, %25 : vector<256x128xf32>
    %c0_14 = arith.constant 0 : index
    %c0_15 = arith.constant 0 : index
    %27 = vector.load %arg7[%c0_14, %c0_15] : memref<256x256xf32, #tpu.memory_space<vmem>>, vector<256x256xf32>
    %cst_16 = arith.constant dense<0.000000e+00> : vector<256x128xf32>
    %28 = tpu.matmul %27, %26, %cst_16 {dimension_numbers = #tpu.dot_dimension_numbers<[1], [0], [0], [1], [0, 0, 1, 1], [], []>} : vector<256x256xf32>, vector<256x128xf32>, vector<256x128xf32> -> vector<256x128xf32>
    %c0_17 = arith.constant 0 : index
    %c0_18 = arith.constant 0 : index
    %29 = vector.load %arg8[%c0_17, %c0_18] : memref<256x1xf32, #tpu.memory_space<vmem>>, vector<256x1xf32>
    %30 = vector.broadcast %29 : vector<256x1xf32> to vector<256x128xf32>
    %31 = arith.addf %28, %30 : vector<256x128xf32>
    %cst_19 = arith.constant 0.000000e+00 : f32
    %32 = vector.broadcast %cst_19 : f32 to vector<256x128xf32>
    %33 = arith.maximumf %31, %32 : vector<256x128xf32>
    %c0_20 = arith.constant 0 : index
    %c0_21 = arith.constant 0 : index
    %34 = vector.load %arg9[%c0_20, %c0_21] : memref<1x256xf32, #tpu.memory_space<vmem>>, vector<1x256xf32>
    %cst_22 = arith.constant dense<0.000000e+00> : vector<1x128xf32>
    %35 = tpu.matmul %34, %33, %cst_22 {dimension_numbers = #tpu.dot_dimension_numbers<[1], [0], [0], [1], [0, 0, 1, 1], [], []>} : vector<1x256xf32>, vector<256x128xf32>, vector<1x128xf32> -> vector<1x128xf32>
    %c0_23 = arith.constant 0 : index
    %c0_24 = arith.constant 0 : index
    %36 = vector.load %arg10[%c0_23, %c0_24] : memref<1x1xf32, #tpu.memory_space<vmem>>, vector<1x1xf32>
    %37 = vector.broadcast %36 : vector<1x1xf32> to vector<1x128xf32>
    %38 = arith.addf %35, %37 : vector<1x128xf32>
    %39 = arith.negf %38 : vector<1x128xf32>
    %40 = math.exp %39 : vector<1x128xf32>
    %cst_25 = arith.constant 1.000000e+00 : f32
    %41 = vector.broadcast %cst_25 : f32 to vector<1x128xf32>
    %42 = arith.addf %41, %40 : vector<1x128xf32>
    %43 = arith.divf %41, %42 : vector<1x128xf32>
    %c0_26 = arith.constant 0 : index
    %c0_27 = arith.constant 0 : index
    %44 = vector.load %arg11[%c0_26, %c0_27] : memref<1x128xf32, #tpu.memory_space<vmem>>, vector<1x128xf32>
    tpu.vector_store %arg11[%c0_26, %c0_27], %43 {strides = array<i32>} : memref<1x128xf32, #tpu.memory_space<vmem>>, vector<1x128xf32>,
    return
  }
  func.func @transform_0(%arg0: i32) -> (i32, i32) {
    %c0_i32 = arith.constant 0 : i32
    %c0_i32_0 = arith.constant 0 : i32
    return %c0_i32, %arg0 : i32, i32
  }
  func.func @transform_1(%arg0: i32) -> (i32, i32) {
    %c0_i32 = arith.constant 0 : i32
    %c0_i32_0 = arith.constant 0 : i32
    %c0_i32_1 = arith.constant 0 : i32
    return %c0_i32, %c0_i32_0 : i32, i32
  }
  func.func @transform_2(%arg0: i32) -> (i32, i32) {
    %c0_i32 = arith.constant 0 : i32
    %c0_i32_0 = arith.constant 0 : i32
    %c0_i32_1 = arith.constant 0 : i32
    return %c0_i32, %c0_i32_0 : i32, i32
  }
  func.func @transform_3(%arg0: i32) -> (i32, i32) {
    %c0_i32 = arith.constant 0 : i32
    %c0_i32_0 = arith.constant 0 : i32
    %c0_i32_1 = arith.constant 0 : i32
    return %c0_i32, %c0_i32_0 : i32, i32
  }
  func.func @transform_4(%arg0: i32) -> (i32, i32) {
    %c0_i32 = arith.constant 0 : i32
    %c0_i32_0 = arith.constant 0 : i32
    %c0_i32_1 = arith.constant 0 : i32
    return %c0_i32, %c0_i32_0 : i32, i32
  }
  func.func @transform_5(%arg0: i32) -> (i32, i32) {
    %c0_i32 = arith.constant 0 : i32
    %c0_i32_0 = arith.constant 0 : i32
    %c0_i32_1 = arith.constant 0 : i32
    return %c0_i32, %c0_i32_0 : i32, i32
  }
  func.func @transform_6(%arg0: i32) -> (i32, i32) {
    %c0_i32 = arith.constant 0 : i32
    %c0_i32_0 = arith.constant 0 : i32
    %c0_i32_1 = arith.constant 0 : i32
    return %c0_i32, %c0_i32_0 : i32, i32
  }
  func.func @transform_7(%arg0: i32) -> (i32, i32) {
    %c0_i32 = arith.constant 0 : i32
    %c0_i32_0 = arith.constant 0 : i32
    %c0_i32_1 = arith.constant 0 : i32
    return %c0_i32, %c0_i32_0 : i32, i32
  }
  func.func @transform_8(%arg0: i32) -> (i32, i32) {
    %c0_i32 = arith.constant 0 : i32
    %c0_i32_0 = arith.constant 0 : i32
    %c0_i32_1 = arith.constant 0 : i32
    return %c0_i32, %c0_i32_0 : i32, i32
  }
  func.func @transform_9(%arg0: i32) -> (i32, i32) {
    %c0_i32 = arith.constant 0 : i32
    %c0_i32_0 = arith.constant 0 : i32
    %c0_i32_1 = arith.constant 0 : i32
    return %c0_i32, %c0_i32_0 : i32, i32
  }
  func.func @transform_10(%arg0: i32) -> (i32, i32) {
    %c0_i32 = arith.constant 0 : i32
    %c0_i32_0 = arith.constant 0 : i32
    return %c0_i32, %arg0 : i32, i32
  }
}

</mosaic_0001>

<bundles_post_ra>
// kernel: _forward_padded.1
= control target key start
LH: loop header
LB: loop body
LE: loop exit
PB: predicated region body
PF: predicated region fallthrough
CT: control target
= control target key end

     0   :  { %s2741_s0 = inlined_call_operand.vmem [shape: f32[2,128], index: 0, kind: input, shape index: {}]   ;;  %s2742_s1 = inlined_call_operand.vmem [shape: f32[14,1], index: 1, kind: input, shape index: {}]   ;;  %s2743_s2 = inlined_call_operand.vmem [shape: f32[14,1], index: 2, kind: input, shape index: {}]   ;;  %s2744_s3 = inlined_call_operand.vmem [shape: f32[14,1], index: 3, kind: input, shape index: {}]   ;;  %s2745_s4 = inlined_call_operand.vmem [shape: f32[256,14], index: 4, kind: input, shape index: {}]   ;;  %s2746_s5 = inlined_call_operand.vmem [shape: f32[256,1], index: 5, kind: input, shape index: {}]   ;;  %s2747_s6 = inlined_call_operand.vmem [shape: f32[256,256], index: 6, kind: input, shape index: {}]   ;;  %s2748_s7 = inlined_call_operand.vmem [shape: f32[256,1], index: 7, kind: input, shape index: {}]   ;;  %s2749_s8 = inlined_call_operand.vmem [shape: f32[1,256], index: 8, kind: input, shape index: {}]   ;;  %s2750_s9 = inlined_call_operand.<no memory space> [shape: f32[1,1], index: 9, kind: input, shape index: {}]   ;;  %s2751_s10 = inlined_call_operand.hbm [shape: f32[1,128], index: 10, kind: output, shape index: {}]  }
   0x1   :  { %v15_v0 = vstv %s2750_s9 }
   0x2   :  { %16 = vst [vmem:[#allocation2] sm:$0x1] %v15_v0 }
   0x3   :  { %v41_v1 = vld [vmem:[%s2742_s1 + $0x8] sm:$0x3f]  ;;  %v40_v2 = vld [vmem:[%s2742_s1] sm:$0xff]  ;;  %v1806_v3 = vmov 0   ;;  %v363_v10 = vld [vmem:[%s2746_s5 + $0x78] sm:$0xff] }
   0x4   :  { %1771 = vset.pattern.permute.xlu1 %v1806_v3  ;;  %1770 = vset.pattern.permute.xlu0 %v1806_v3  ;;  %v43_v4 = vld [vmem:[%s2743_s2 + $0x8] sm:$0x3f]  ;;  %v42_v5 = vld [vmem:[%s2743_s2] sm:$0xff]  ;;  %v362_v11 = vld [vmem:[%s2746_s5 + $0x70] sm:$0xff] }
   0x5   :  { %53 = vperm.xlu0 %1770, %v41_v1   ;;  %48 = vperm.xlu1 %1771, %v40_v2   ;;  %v45_v6 = vld [vmem:[%s2744_s3 + $0x8] sm:$0x3f]  ;;  %v44_v8 = vld [vmem:[%s2744_s3] sm:$0xff] }
   0x6   :  { %v301_v7 = vsub.f32 1.0, %v45_v6  ;;  %v300_v9 = vsub.f32 1.0, %v44_v8  ;;  %v361_v12 = vld [vmem:[%s2746_s5 + $0x68] sm:$0xff]  ;;  %v360_v13 = vld [vmem:[%s2746_s5 + $0x60] sm:$0xff] }
   0x9   :  { %69 = vperm.xlu0 %1770, %v43_v4   ;;  %64 = vperm.xlu1 %1771, %v42_v5  }
   0xd   :  { %295 = vperm.xlu0 %1770, %v45_v6   ;;  %309 = vperm.xlu1 %1771, %v301_v7  }
  0x11   :  { %290 = vperm.xlu0 %1770, %v44_v8   ;;  %304 = vperm.xlu1 %1771, %v300_v9  }
  0x15   :  { %457 = vperm.xlu0 %1770, %v363_v10   ;;  %452 = vperm.xlu1 %1771, %v362_v11  }
  0x19   :  { %447 = vperm.xlu0 %1770, %v361_v12   ;;  %442 = vperm.xlu1 %1771, %v360_v13  }
  0x1a   :  { %17 = vsyncpa [#allocation4], 0  ;;  %v359_v14 = vld [vmem:[%s2746_s5 + $0x58] sm:$0xff]  ;;  %v358_v15 = vld [vmem:[%s2746_s5 + $0x50] sm:$0xff]  ;;  %vm540_vm0 = vcmask 113664  }
  0x1b   :  { %v357_v16 = vld [vmem:[%s2746_s5 + $0x48] sm:$0xff]  ;;  %v356_v17 = vld [vmem:[%s2746_s5 + $0x40] sm:$0xff]  ;;  %v355_v18 = vld [vmem:[%s2746_s5 + $0x38] sm:$0xff] }
  0x1c   :  { %v354_v19 = vld [vmem:[%s2746_s5 + $0x30] sm:$0xff]  ;;  %v353_v20 = vld [vmem:[%s2746_s5 + $0x28] sm:$0xff]  ;;  %v352_v21 = vld [vmem:[%s2746_s5 + $0x20] sm:$0xff] }
  0x1d   :  { %437 = vperm.xlu0 %1770, %v359_v14   ;;  %432 = vperm.xlu1 %1771, %v358_v15   ;;  %v351_v22 = vld [vmem:[%s2746_s5 + $0x18] sm:$0xff]  ;;  %v350_v23 = vld [vmem:[%s2746_s5 + $0x10] sm:$0xff]  ;;  %v349_v24 = vld [vmem:[%s2746_s5 + $0x8] sm:$0xff] }
  0x1e   :  { %v348_v25 = vld [vmem:[%s2746_s5] sm:$0xff]  ;;  %v379_v26 = vld [vmem:[%s2746_s5 + $0xf8] sm:$0xff]  ;;  %v378_v27 = vld [vmem:[%s2746_s5 + $0xf0] sm:$0xff] }
  0x1f   :  { %v377_v28 = vld [vmem:[%s2746_s5 + $0xe8] sm:$0xff]  ;;  %v376_v29 = vld [vmem:[%s2746_s5 + $0xe0] sm:$0xff]  ;;  %v375_v30 = vld [vmem:[%s2746_s5 + $0xd8] sm:$0xff] }
  0x20   :  { %v374_v31 = vld [vmem:[%s2746_s5 + $0xd0] sm:$0xff]  ;;  %v373_v32 = vld [vmem:[%s2746_s5 + $0xc8] sm:$0xff]  ;;  %v372_v33 = vld [vmem:[%s2746_s5 + $0xc0] sm:$0xff] }
  0x21   :  { %427 = vperm.xlu0 %1770, %v357_v16   ;;  %422 = vperm.xlu1 %1771, %v356_v17   ;;  %v371_v34 = vld [vmem:[%s2746_s5 + $0xb8] sm:$0xff]  ;;  %v370_v35 = vld [vmem:[%s2746_s5 + $0xb0] sm:$0xff]  ;;  %v369_v36 = vld [vmem:[%s2746_s5 + $0xa8] sm:$0xff] }
  0x22   :  { %v368_v37 = vld [vmem:[%s2746_s5 + $0xa0] sm:$0xff]  ;;  %v367_v38 = vld [vmem:[%s2746_s5 + $0x98] sm:$0xff]  ;;  %v366_v39 = vld [vmem:[%s2746_s5 + $0x90] sm:$0xff] }
  0x23   :  { %v365_v40 = vld [vmem:[%s2746_s5 + $0x88] sm:$0xff]  ;;  %v364_v41 = vld [vmem:[%s2746_s5 + $0x80] sm:$0xff]  ;;  %v993_v42 = vld [vmem:[%s2748_s7 + $0xf8] sm:$0xff] }
  0x24   :  { %v977_v43 = vld [vmem:[%s2748_s7 + $0x78] sm:$0xff]  ;;  %v992_v44 = vld [vmem:[%s2748_s7 + $0xf0] sm:$0xff]  ;;  %v991_v46 = vld [vmem:[%s2748_s7 + $0xe8] sm:$0xff] }
  0x25   :  { %417 = vperm.xlu0 %1770, %v355_v18   ;;  %412 = vperm.xlu1 %1771, %v354_v19   ;;  %v976_v45 = vld [vmem:[%s2748_s7 + $0x70] sm:$0xff]  ;;  %v975_v47 = vld [vmem:[%s2748_s7 + $0x68] sm:$0xff]  ;;  %v990_v48 = vld [vmem:[%s2748_s7 + $0xe0] sm:$0xff] }
  0x26   :  { %v974_v49 = vld [vmem:[%s2748_s7 + $0x60] sm:$0xff]  ;;  %v989_v50 = vld [vmem:[%s2748_s7 + $0xd8] sm:$0xff]  ;;  %v988_v52 = vld [vmem:[%s2748_s7 + $0xd0] sm:$0xff] }
  0x27   :  { %v973_v51 = vld [vmem:[%s2748_s7 + $0x58] sm:$0xff]  ;;  %v972_v53 = vld [vmem:[%s2748_s7 + $0x50] sm:$0xff]  ;;  %v987_v54 = vld [vmem:[%s2748_s7 + $0xc8] sm:$0xff] }
  0x28   :  { %v971_v55 = vld [vmem:[%s2748_s7 + $0x48] sm:$0xff]  ;;  %v316_v56 = vld [vmem:[%s2745_s4] sm:$0xff]  ;;  %v985_v59 = vld [vmem:[%s2748_s7 + $0xb8] sm:$0xff] }
  0x29   :  { %407 = vperm.xlu0 %1770, %v353_v20   ;;  %402 = vperm.xlu1 %1771, %v352_v21   ;;  %v986_v57 = vld [vmem:[%s2748_s7 + $0xc0] sm:$0xff]  ;;  %v969_v60 = vld [vmem:[%s2748_s7 + $0x38] sm:$0xff]  ;;  %v984_v61 = vld [vmem:[%s2748_s7 + $0xb0] sm:$0xff] }
  0x2a   :  { %v970_v58 = vld [vmem:[%s2748_s7 + $0x40] sm:$0xff]  ;;  %1641 = vmatprep.mubr.msk.f32.mxu0 %vm540_vm0, %v316_v56  ;;  %v968_v62 = vld [vmem:[%s2748_s7 + $0x30] sm:$0xff]  ;;  %v983_v63 = vld [vmem:[%s2748_s7 + $0xa8] sm:$0xff]  ;;  %v1810_v56 = vmov 2102212464  }
  0x2b   :  { %v967_v0 = vld [vmem:[%s2748_s7 + $0x28] sm:$0xff]  ;;  %v982_v1 = vld [vmem:[%s2748_s7 + $0xa0] sm:$0xff]  ;;  %v981_v7 = vld [vmem:[%s2748_s7 + $0x98] sm:$0xff] }
  0x2c   :  { %v966_v2 = vld [vmem:[%s2748_s7 + $0x20] sm:$0xff]  ;;  %v965_v8 = vld [vmem:[%s2748_s7 + $0x18] sm:$0xff]  ;;  %v980_v15 = vld [vmem:[%s2748_s7 + $0x90] sm:$0xff] }
  0x2d   :  { %397 = vperm.xlu0 %1770, %v351_v22   ;;  %392 = vperm.xlu1 %1771, %v350_v23   ;;  %v1524_v5 = vld [vmem:[%s2741_s0] ss:$0 sm:$0xff]  ;;  %v1525_v6 = vld [vmem:[%s2741_s0 + $0x1] ss:$0 sm:$0xff]  ;;  %v964_v16 = vld [vmem:[%s2748_s7 + $0x10] sm:$0xff] }
  0x2e   :  { %v979_v23 = vld [vmem:[%s2748_s7 + $0x88] sm:$0xff] }
  0x31   :  { %387 = vperm.xlu0 %1770, %v349_v24   ;;  %382 = vperm.xlu1 %1771, %v348_v25   ;;  %v963_v24 = vld [vmem:[%s2748_s7 + $0x8] sm:$0xff] }
  0x35   :  { %537 = vperm.xlu0 %1770, %v379_v26   ;;  %532 = vperm.xlu1 %1771, %v378_v27  }
  0x39   :  { %527 = vperm.xlu0 %1770, %v377_v28   ;;  %522 = vperm.xlu1 %1771, %v376_v29  }
  0x3d   :  { %517 = vperm.xlu0 %1770, %v375_v30   ;;  %512 = vperm.xlu1 %1771, %v374_v31   ;;  %v978_v31 = vld [vmem:[%s2748_s7 + $0x80] sm:$0xff] }
  0x41   :  { %507 = vperm.xlu0 %1770, %v373_v32   ;;  %502 = vperm.xlu1 %1771, %v372_v33   ;;  %v962_v32 = vld [vmem:[%s2748_s7] sm:$0xff] }
  0x45   :  { %497 = vperm.xlu0 %1770, %v371_v34   ;;  %492 = vperm.xlu1 %1771, %v370_v35  }
  0x49   :  { %487 = vperm.xlu0 %1770, %v369_v36   ;;  %482 = vperm.xlu1 %1771, %v368_v37  }
  0x4d   :  { %477 = vperm.xlu0 %1770, %v367_v38   ;;  %472 = vperm.xlu1 %1771, %v366_v39   ;;  %v1412_v39 = vld [vmem:[#allocation2] sm:$0x1] }
  0x51   :  { %467 = vperm.xlu0 %1770, %v365_v40   ;;  %462 = vperm.xlu1 %1771, %v364_v41  }
  0x55   :  { %1151 = vperm.xlu0 %1770, %v993_v42   ;;  %1071 = vperm.xlu1 %1771, %v977_v43  }
  0x59   :  { %1146 = vperm.xlu0 %1770, %v992_v44   ;;  %1066 = vperm.xlu1 %1771, %v976_v45  }
  0x5d   :  { %1141 = vperm.xlu0 %1770, %v991_v46   ;;  %1061 = vperm.xlu1 %1771, %v975_v47  }
  0x61   :  { %1136 = vperm.xlu0 %1770, %v990_v48   ;;  %1056 = vperm.xlu1 %1771, %v974_v49   ;;  %v1807_v48 = vmov 683565275  }
  0x65   :  { %1131 = vperm.xlu0 %1770, %v989_v50   ;;  %1051 = vperm.xlu1 %1771, %v973_v51   ;;  %v1808_v50 = vmov 2475754826  }
  0x69   :  { %1126 = vperm.xlu0 %1770, %v988_v52   ;;  %1046 = vperm.xlu1 %1771, %v972_v53   ;;  %v1809_v52 = vmov 2131351028  }
  0x6d   :  { %1121 = vperm.xlu0 %1770, %v987_v54   ;;  %1041 = vperm.xlu1 %1771, %v971_v55  }
  0x71   :  { %1116 = vperm.xlu0 %1770, %v986_v57   ;;  %1036 = vperm.xlu1 %1771, %v970_v58  }
  0x75   :  { %1111 = vperm.xlu0 %1770, %v985_v59   ;;  %1031 = vperm.xlu1 %1771, %v969_v60   ;;  %v1811_v59 = vmov 920167782  }
  0x79   :  { %1106 = vperm.xlu0 %1770, %v984_v61   ;;  %1026 = vperm.xlu1 %1771, %v968_v62   ;;  %v1812_v62 = vmov 1326507024  }
  0x7d   :  { %1101 = vperm.xlu0 %1770, %v983_v63   ;;  %1021 = vperm.xlu1 %1771, %v967_v0  }
  0x80   :  { %v54_v3 = vpop.permute.xlu0 %53  ;;  %v49_v4 = vpop.permute.xlu1 %48 }
  0x81   :  { %1096 = vperm.xlu0 %1770, %v982_v1   ;;  %1016 = vperm.xlu1 %1771, %v966_v2   ;;  %v61_v9 = vmul.f32 %v1524_v5, %v54_v3  ;;  %v60_v12 = vmul.f32 %v1524_v5, %v49_v4 }
  0x84   :  { %v70_v10 = vpop.permute.xlu0 %69  ;;  %v65_v11 = vpop.permute.xlu1 %64 }
  0x85   :  { %v77_v13 = vmul.f32 %v1525_v6, %v70_v10  ;;  %v76_v14 = vmul.f32 %v1525_v6, %v65_v11  ;;  %1091 = vperm.xlu0 %1770, %v981_v7   ;;  %1011 = vperm.xlu1 %1771, %v965_v8  }
  0x87   :  { %v2081_v17 = vadd.f32 %v77_v13, %v61_v9  ;;  %v2083_v18 = vadd.f32 %v76_v14, %v60_v12 }
  0x89   :  { %v187_v19 = vand.u32 2139095040, %v2081_v17  ;;  %v83_v20 = vand.u32 2139095040, %v2083_v18  ;;  %v184_v21 = vand.u32 2147483647, %v2081_v17  ;;  %1086 = vperm.xlu0 %1770, %v980_v15   ;;  %1006 = vperm.xlu1 %1771, %v964_v16   ;;  %v80_v22 = vand.u32 2147483647, %v2083_v18 }
  0x8a   :  { %vm186_vm15 = vcmp.lt.s32.totalorder %v2081_v17, 0 }
  0x8b   :  { %v188_v25 = vshrl.u32 %v187_v19, 23  ;;  %v84_v26 = vshrl.u32 %v83_v20, 23  ;;  %v191_v29 = vand.u32 8388607, %v184_v21  ;;  %v87_v30 = vand.u32 8388607, %v80_v22 }
  0x8d   :  { %v1530_v27 = vadd.s32 4294967169, %v188_v25  ;;  %v1526_v28 = vadd.s32 4294967169, %v84_v26  ;;  %1081 = vperm.xlu0 %1770, %v979_v23   ;;  %1001 = vperm.xlu1 %1771, %v963_v24   ;;  %v192_v35 = vor.u32 8388608, %v191_v29  ;;  %v88_v36 = vor.u32 8388608, %v87_v30 }
  0x8f   :  { %v194_v33 = vadd.s32 1, %v1530_v27  ;;  %v90_v34 = vadd.s32 1, %v1526_v28  ;;  %v2109_v45 = vshll.u32 %v192_v35, 8  ;;  %v2111_v46 = vshll.u32 %v88_v36, 8 }
  0x91   :  { %vm195_vm1 = vcmp.gt.s32.totalorder %v194_v33, 0  ;;  %vm91_vm2 = vcmp.gt.s32.totalorder %v90_v34, 0  ;;  %1076 = vperm.xlu0 %1770, %v978_v31   ;;  %996 = vperm.xlu1 %1771, %v962_v32  }
  0x92   :  { %v196_v37 = vsel %vm195_vm1, %v194_v33, 0  ;;  %v92_v38 = vsel %vm91_vm2, %v90_v34, 0  ;;  %vm185_vm1 = vcmp.le.f32.partialorder %v184_v21, 0.7853982  ;;  %vm82_vm2 = vcmp.lt.s32.totalorder %v2083_v18, 0 }
  0x93   :  { %v198_v40 = vand.u32 31, %v196_v37  ;;  %v2105_v41 = vand.u32 31, %v92_v38  ;;  %v197_v42 = vshrl.u32 %v196_v37, 5  ;;  %v2107_v44 = vshrl.u32 %v92_v38, 5 }
  0x95   :  { %v199_v43 = vsub.s32 32, %v198_v40  ;;  %1415 = vperm.xlu0 %1770, %v1412_v39   ;;  %v95_v47 = vsub.s32 32, %v2105_v41  ;;  %v201_v49 = vshll.u32 %v1807_v48, %v198_v40  ;;  %v204_v51 = vshll.u32 %v1808_v50, %v198_v40 }
  0x96   :  { %v207_v53 = vshll.u32 %v1809_v52, %v198_v40  ;;  %v210_v58 = vshll.u32 %v1810_v56, %v198_v40  ;;  %v213_v61 = vshll.u32 %v1811_v59, %v198_v40  ;;  %vm216_vm3 = vcmp.lt.s32.totalorder %v197_v42, 1 }
  0x97   :  { %v202_v54 = vshrl.u32 %v1808_v50, %v199_v43  ;;  %v205_v55 = vshrl.u32 %v1809_v52, %v199_v43  ;;  %v208_v57 = vshrl.u32 %v1810_v56, %v199_v43  ;;  %v211_v60 = vshrl.u32 %v1811_v59, %v199_v43 }
  0x98   :  { %v214_v63 = vshrl.u32 %v1812_v62, %v199_v43  ;;  %v200_v0 = vshrl.u32 %v1807_v48, %v199_v43  ;;  %vm218_vm4 = vcmp.lt.s32.totalorder %v197_v42, 3  ;;  %vm219_vm5 = vcmp.lt.s32.totalorder %v197_v42, 4 }
  0x99   :  { %v203_v1 = vor.u32 %v202_v54, %v201_v49  ;;  %v206_v2 = vor.u32 %v205_v55, %v204_v51  ;;  %v209_v3 = vor.u32 %v208_v57, %v207_v53  ;;  %v212_v4 = vor.u32 %v211_v60, %v210_v58 }
  0x9a   :  { %v215_v5 = vor.u32 %v214_v63, %v213_v61  ;;  %v98_v13 = vshrl.u32 %v1808_v50, %v95_v47  ;;  %vm217_vm6 = vcmp.lt.s32.totalorder %v197_v42, 2  ;;  %v97_v16 = vshll.u32 %v1807_v48, %v2105_v41 }
  0x9b   :  { %v220_v6 = vsel %vm216_vm3, %v200_v0, %v203_v1  ;;  %v221_v7 = vsel %vm219_vm5, %v209_v3, 2102212464  ;;  %v224_v8 = vsel %vm216_vm3, %v203_v1, %v206_v2  ;;  %v228_v9 = vsel %vm216_vm3, %v206_v2, %v209_v3 }
  0x9c   :  { %v222_v10 = vsel %vm218_vm4, %v206_v2, %v221_v7  ;;  %v225_v11 = vsel %vm219_vm5, %v212_v4, 920167782  ;;  %v229_v12 = vsel %vm219_vm5, %v215_v5, 1326507024  ;;  %v100_v24 = vshll.u32 %v1808_v50, %v2105_v41 }
  0x9d   :  { %v226_v14 = vsel %vm218_vm4, %v209_v3, %v225_v11  ;;  %v230_v15 = vsel %vm218_vm4, %v212_v4, %v229_v12  ;;  %v223_v19 = vsel %vm217_vm6, %v220_v6, %v222_v10  ;;  %v99_v29 = vor.u32 %v98_v13, %v97_v16 }
  0x9e   :  { %v227_v20 = vsel %vm217_vm6, %v224_v8, %v226_v14  ;;  %v231_v23 = vsel %vm217_vm6, %v228_v9, %v230_v15  ;;  %v101_v30 = vshrl.u32 %v1809_v52, %v95_v47  ;;  %v103_v31 = vshll.u32 %v1809_v52, %v2105_v41 }
  0x9f   :  { %v2117_v25 = vmul.u32.u64.low %v2109_v45, %v231_v23  ;;  %v2118_v26 = vmul.u32.u64.high %v2109_v45, %v231_v23, %v2117_v25  ;;  %v2121_v27 = vmul.u32.u64.low %v2109_v45, %v227_v20  ;;  %v2122_v28 = vmul.u32.u64.high %v2109_v45, %v227_v20, %v2121_v27 }
  0xa0   :  { %v104_v32 = vshrl.u32 %v1810_v56, %v95_v47  ;;  %v96_v33 = vshrl.u32 %v1807_v48, %v95_v47  ;;  %v106_v34 = vshll.u32 %v1810_v56, %v2105_v41  ;;  %v107_v35 = vshrl.u32 %v1811_v59, %v95_v47 }
  0xa1   :  { %v110_v36 = vshrl.u32 %v1812_v62, %v95_v47  ;;  %v239_v37 = vmul.u32 %v2109_v45, %v223_v19  ;;  %v102_v38 = vor.u32 %v101_v30, %v100_v24  ;;  %v109_v40 = vshll.u32 %v1811_v59, %v2105_v41 }
  0xa2   :  { %v105_v39 = vor.u32 %v104_v32, %v103_v31  ;;  %vm241_vm7 = vc.u32 %v2118_v26, %v2121_v27  ;;  %v242_v42 = vadd.s32 1, %v2122_v28  ;;  %v108_v43 = vor.u32 %v107_v35, %v106_v34 }
  0xa3   :  { %vm112_vm8 = vcmp.lt.s32.totalorder %v2107_v44, 1  ;;  %v111_v49 = vor.u32 %v110_v36, %v109_v40  ;;  %vm114_vm9 = vcmp.lt.s32.totalorder %v2107_v44, 3  ;;  %vm115_vm10 = vcmp.lt.s32.totalorder %v2107_v44, 4 }
  0xa4   :  { %v120_v48 = vsel %vm112_vm8, %v99_v29, %v102_v38  ;;  %v243_v47 = vsel %vm241_vm7, %v242_v42, %v2122_v28  ;;  %v117_v45 = vsel %vm115_vm10, %v105_v39, 2102212464  ;;  %v121_v50 = vsel %vm115_vm10, %v108_v43, 920167782 }
  0xa5   :  { %v124_v51 = vsel %vm112_vm8, %v102_v38, %v105_v39  ;;  %v244_v52 = vadd.s32 %v243_v47, %v239_v37  ;;  %vm113_vm11 = vcmp.lt.s32.totalorder %v2107_v44, 2  ;;  %v122_v41 = vsel %vm114_vm9, %v105_v39, %v121_v50 }
  0xa6   :  { %v125_v53 = vsel %vm115_vm10, %v111_v49, 1326507024  ;;  %v116_v54 = vsel %vm112_vm8, %v96_v33, %v99_v29  ;;  %v118_v55 = vsel %vm114_vm9, %v102_v38, %v117_v45  ;;  %v123_v56 = vsel %vm113_vm11, %v120_v48, %v122_v41 }
  0xa7   :  { %v126_v57 = vsel %vm114_vm9, %v108_v43, %v125_v53  ;;  %v245_v58 = vadd.s32 536870912, %v244_v52  ;;  %v2136_v60 = vmul.u32.u64.low %v2111_v46, %v123_v56  ;;  %v2137_v61 = vmul.u32.u64.high %v2111_v46, %v123_v56, %v2136_v60 }
  0xa8   :  { %v127_v59 = vsel %vm113_vm11, %v124_v51, %v126_v57  ;;  %v119_v1 = vsel %vm113_vm11, %v116_v54, %v118_v55  ;;  %v240_v19 = vadd.s32 %v2121_v27, %v2118_v26  ;;  %vm81_vm3 = vcmp.le.f32.partialorder %v80_v22, 0.7853982 }
  0xa9   :  { %v2140_v62 = vmul.u32.u64.low %v2111_v46, %v127_v59  ;;  %v2141_v63 = vmul.u32.u64.high %v2111_v46, %v127_v59, %v2140_v62  ;;  %v246_v0 = vshrl.u32 %v245_v58, 30  ;;  %v138_v44 = vadd.s32 1, %v2137_v61 }
  0xaa   :  { %v135_v3 = vmul.u32 %v2111_v46, %v119_v1  ;;  %vm276_vm7 = vweird.f32 %v2081_v17  ;;  %vm637_vm8 = vcmask 1045504  }
  0xab   :  { %v247_v2 = vshll.u32 %v246_v0, 30  ;;  %vm137_vm12 = vc.u32 %v2141_v63, %v2136_v60  ;;  %v136_v37 = vadd.s32 %v2136_v60, %v2141_v63  ;;  %v270_v49 = vsub.s32 4, %v246_v0 }
  0xac   :  { %v139_v5 = vsel %vm137_vm12, %v138_v44, %v2137_v61  ;;  %vm172_vm12 = vweird.f32 %v2083_v18 }
  0xad   :  { %v248_v4 = vsub.s32 %v244_v52, %v247_v2  ;;  %v140_v6 = vadd.s32 %v139_v5, %v135_v3  ;;  %v271_v52 = vsel %vm186_vm15, %v270_v49, %v246_v0  ;;  %v310_v5 = vpop.permute.xlu1 %309  ;;  %v334_v49 = vld [vmem:[%s2745_s4 + $0x90] sm:$0xff] }
  0xae   :  { %v273_v55 = vsel %vm185_vm1, 0, %v271_v52  ;;  %v340_v52 = vld [vmem:[%s2745_s4 + $0xc0] sm:$0xff] }
  0xaf   :  { %v250_v7 = vsub.s32 0, %v248_v4  ;;  %v141_v8 = vadd.s32 536870912, %v140_v6  ;;  %v277_v58 = vadd.s32 3, %v273_v55  ;;  %v344_v55 = vld [vmem:[%s2745_s4 + $0xe0] sm:$0xff] }
  0xb1   :  { %v1531_v9 = vmin.u32 %v250_v7, %v248_v4  ;;  %v142_v10 = vshrl.u32 %v141_v8, 30  ;;  %v278_v61 = vand.u32 3, %v277_v58  ;;  %v347_v58 = vld [vmem:[%s2745_s4 + $0xf8] sm:$0xff] }
  0xb3   :  { %v252_v11 = vclz %v1531_v9  ;;  %v143_v12 = vshll.u32 %v142_v10, 30  ;;  %v166_v57 = vsub.s32 4, %v142_v10  ;;  %vm283_vm4 = vcmp.eq.s32.totalorder %v278_v61, 2 }
  0xb4   :  { %vm280_vm5 = vcmp.eq.s32.totalorder %v278_v61, 0  ;;  %vm279_vm6 = vcmp.lt.s32.totalorder %v278_v61, 2  ;;  %v313_v9 = vmul.f32 %v310_v5, %v2081_v17 }
  0xb5   :  { %v1532_v13 = vadd.s32 4294967294, %v252_v11  ;;  %v144_v14 = vsub.s32 %v140_v6, %v143_v12  ;;  %v167_v60 = vsel %vm82_vm2, %v166_v57, %v142_v10  ;;  %v296_v6 = vpop.permute.xlu0 %295  ;;  %v346_v57 = vld [vmem:[%s2745_s4 + $0xf0] sm:$0xff] }
  0xb6   :  { %v169_v63 = vsel %vm81_vm3, 0, %v167_v60  ;;  %v929_v60 = vld [vmem:[%s2747_s6 + $0xf8] sm:$0xff] }
  0xb7   :  { %vm1533_vm13 = vcmp.lt.s32.totalorder %v1532_v13, 0  ;;  %v146_v16 = vsub.s32 0, %v144_v14  ;;  %v173_v3 = vadd.s32 3, %v169_v63  ;;  %1293 = vmatprep.mubr.f32.mxu1 %v929_v60 }
  0xb8   :  { %v255_v15 = vsel %vm1533_vm13, 0, %v1532_v13 }
  0xb9   :  { %v256_v46 = vsub.s32 32, %v255_v15  ;;  %v260_v20 = vsub.s32 4294967266, %v255_v15  ;;  %v1527_v23 = vmin.u32 %v146_v16, %v144_v14  ;;  %v257_v24 = vshll.u32 %v248_v4, %v255_v15 }
  0xba   :  { %v174_v10 = vand.u32 3, %v173_v3 }
  0xbb   :  { %v258_v25 = vshrl.u32 %v240_v19, %v256_v46  ;;  %v261_v28 = vadd.s32 127, %v260_v20  ;;  %v148_v29 = vclz %v1527_v23  ;;  %v305_v46 = vpop.permute.xlu1 %304  ;;  %v291_v23 = vpop.permute.xlu0 %290 }
  0xbc   :  { %vm179_vm9 = vcmp.eq.s32.totalorder %v174_v10, 2  ;;  %vm176_vm10 = vcmp.eq.s32.totalorder %v174_v10, 0  ;;  %vm175_vm11 = vcmp.lt.s32.totalorder %v174_v10, 2 }
  0xbd   :  { %v259_v30 = vor.u32 %v258_v25, %v257_v24  ;;  %v262_v31 = vshll.u32 %v261_v28, 23  ;;  %v1528_v32 = vadd.s32 4294967294, %v148_v29  ;;  %v312_v25 = vmul.f32 %v305_v46, %v2083_v18  ;;  %v317_v29 = vld [vmem:[%s2745_s4 + $0x8] sm:$0xff] }
  0xbf   :  { %v263_v33 = vor.u32 4788187, %v262_v31  ;;  %vm1529_vm14 = vcmp.lt.s32.totalorder %v1528_v32, 0  ;;  %v266_v35 = vcvt.s32.f32 %v259_v30  ;;  %v318_v30 = vld [vmem:[%s2745_s4 + $0x10] sm:$0xff]  ;;  %v319_v31 = vld [vmem:[%s2745_s4 + $0x18] sm:$0xff]  ;;  %v458_v61 = vpop.permute.xlu0 %457 }
  0xc0   :  { %v151_v36 = vsel %vm1529_vm14, 0, %v1528_v32  ;;  %v321_v32 = vld [vmem:[%s2745_s4 + $0x28] sm:$0xff] }
  0xc1   :  { %v264_v34 = vand.u32 2147483647, %v263_v33  ;;  %v152_v38 = vsub.s32 32, %v151_v36  ;;  %v156_v39 = vsub.s32 4294967266, %v151_v36  ;;  %v153_v27 = vshll.u32 %v144_v14, %v151_v36  ;;  %v322_v33 = vld [vmem:[%s2745_s4 + $0x30] sm:$0xff]  ;;  %v325_v36 = vld [vmem:[%s2745_s4 + $0x48] sm:$0xff] }
  0xc3   :  { %v267_v26 = vmul.f32 %v266_v35, %v264_v34  ;;  %v154_v40 = vshrl.u32 %v136_v37, %v152_v38  ;;  %v157_v42 = vadd.s32 127, %v156_v39  ;;  %v323_v34 = vld [vmem:[%s2745_s4 + $0x38] sm:$0xff]  ;;  %v324_v35 = vld [vmem:[%s2745_s4 + $0x40] sm:$0xff]  ;;  %v326_v37 = vld [vmem:[%s2745_s4 + $0x50] sm:$0xff] }
  0xc4   :  { %v327_v38 = vld [vmem:[%s2745_s4 + $0x58] sm:$0xff]  ;;  %v328_v39 = vld [vmem:[%s2745_s4 + $0x60] sm:$0xff] }
  0xc5   :  { %v268_v43 = vxor.u32 2147483648, %v267_v26  ;;  %v155_v48 = vor.u32 %v154_v40, %v153_v27  ;;  %v158_v47 = vshll.u32 %v157_v42, 23  ;;  %v330_v27 = vld [vmem:[%s2745_s4 + $0x70] sm:$0xff]  ;;  %v331_v40 = vld [vmem:[%s2745_s4 + $0x78] sm:$0xff]  ;;  %v332_v42 = vld [vmem:[%s2745_s4 + $0x80] sm:$0xff] }
  0xc7   :  { %v269_v45 = vsel %vm186_vm15, %v268_v43, %v267_v26  ;;  %v159_v51 = vor.u32 4788187, %v158_v47  ;;  %v162_v53 = vcvt.s32.f32 %v155_v48  ;;  %v329_v26 = vld [vmem:[%s2745_s4 + $0x68] sm:$0xff]  ;;  %v335_v48 = vld [vmem:[%s2745_s4 + $0x98] sm:$0xff]  ;;  %v336_v47 = vld [vmem:[%s2745_s4 + $0xa0] sm:$0xff] }
  0xc8   :  { %v272_v50 = vsel %vm185_vm1, %v2081_v17, %v269_v45  ;;  %v333_v43 = vld [vmem:[%s2745_s4 + $0x88] sm:$0xff] }
  0xc9   :  { %1772 = vcosq.f32 %v272_v50  ;;  %v160_v41 = vand.u32 2147483647, %v159_v51  ;;  %v337_v45 = vld [vmem:[%s2745_s4 + $0xa8] sm:$0xff]  ;;  %v339_v51 = vld [vmem:[%s2745_s4 + $0xb8] sm:$0xff] }
  0xca   :  { %1774 = vsinq.f32 %v272_v50  ;;  %v338_v50 = vld [vmem:[%s2745_s4 + $0xb0] sm:$0xff] }
  0xcb   :  { %v163_v54 = vmul.f32 %v162_v53, %v160_v41  ;;  %v341_v41 = vld [vmem:[%s2745_s4 + $0xc8] sm:$0xff]  ;;  %v342_v53 = vld [vmem:[%s2745_s4 + $0xd0] sm:$0xff] }
  0xcd   :  { %v164_v56 = vxor.u32 2147483648, %v163_v54 }
  0xcf   :  { %v165_v21 = vsel %vm82_vm2, %v164_v56, %v163_v54  ;;  %v343_v54 = vld [vmem:[%s2745_s4 + $0xd8] sm:$0xff]  ;;  %v345_v56 = vld [vmem:[%s2745_s4 + $0xe8] sm:$0xff] }
  0xd0   :  { %v168_v59 = vsel %vm81_vm3, %v2083_v18, %v165_v21  ;;  %v320_v18 = vld [vmem:[%s2745_s4 + $0x20] sm:$0xff]  ;;  %v1813_v21 = vmov 0.0  }
  0xd1   :  { %1776 = vcosq.f32 %v168_v59  ;;  %1689 = vmatprep.subr.mxu1 %v1813_v21 }
  0xd2   :  { %1778 = vsinq.f32 %v168_v59  ;;  %v899_v59 = vld [vmem:[%s2747_s6 + $0x8] sm:$0xff] }
  0xd6   :  { %v1773_v62 = vpop.eup %1772 }
  0xd7   :  { %v1775_v0 = vpop.eup %1774  ;;  %v284_v1 = vxor.u32 2147483648, %v1773_v62 }
  0xd8   :  { %v281_v2 = vxor.u32 2147483648, %v1775_v0 }
  0xd9   :  { %v285_v44 = vsel %vm283_vm4, %v284_v1, %v1775_v0  ;;  %v448_v0 = vpop.permute.xlu0 %447 }
  0xda   :  { %v282_v4 = vsel %vm280_vm5, %v1773_v62, %v281_v2  ;;  %v453_v62 = vpop.permute.xlu1 %452 }
  0xdb   :  { %v286_v22 = vsel %vm279_vm6, %v282_v4, %v285_v44 }
  0xdc   :  { %v287_v7 = vsel %vm276_vm7, nan, %v286_v22 }
  0xdd   :  { %v299_v8 = vmul.f32 %v296_v6, %v287_v7  ;;  %v438_v4 = vpop.permute.xlu0 %437 }
  0xde   :  { %v1777_v11 = vpop.eup %1776  ;;  %v443_v2 = vpop.permute.xlu1 %442 }
  0xdf   :  { %v315_v12 = vadd.f32 %v313_v9, %v299_v8  ;;  %v1779_v13 = vpop.eup %1778  ;;  %v180_v14 = vxor.u32 2147483648, %v1777_v11 }
  0xe0   :  { %v177_v15 = vxor.u32 2147483648, %v1779_v13 }
  0xe1   :  { %1637 = vmatprep.subr.msk.mxu0 %vm637_vm8, %v315_v12  ;;  %v181_v16 = vsel %vm179_vm9, %v180_v14, %v1779_v13  ;;  %v428_v8 = vpop.permute.xlu0 %427 }
  0xe2   :  { %1638 = vmatpush3.msk.msra.mxu0 %vm637_vm8, %v315_v12  ;;  %v178_v19 = vsel %vm176_vm10, %v1777_v11, %v177_v15  ;;  %v433_v22 = vpop.permute.xlu1 %432 }
  0xe3   :  { %v182_v20 = vsel %vm175_vm11, %v178_v19, %v181_v16 }
  0xe4   :  { %v183_v17 = vsel %vm172_vm12, nan, %v182_v20 }
  0xe5   :  { %v298_v24 = vmul.f32 %v291_v23, %v183_v17  ;;  %v418_v13 = vpop.permute.xlu0 %417 }
  0xe6   :  { %v423_v10 = vpop.permute.xlu1 %422 }
  0xe7   :  { %v314_v28 = vadd.f32 %v312_v25, %v298_v24 }
  0xe9   :  { %1639 = vmatprep.subr.mxu0 %v314_v28  ;;  %v2307_v46 = vpop.permute.xlu0 %407 }
  0xea   :  { %1640 = vmatpush3.msra.mxu0 %v314_v28  ;;  %v413_v15 = vpop.permute.xlu1 %412 }
  0xeb   :  { %1642 = vmatmul.mubr.msk.f32.vlgmr.msra.gmra.mxu0 %vm540_vm0, %v317_v29  ;;  %1154 = vmatprep.subr.mxu0 %v1813_v21 }
  0xec   :  { %1644 = vmatprep.mubr.msk.f32.mxu0 %vm540_vm0, %v318_v30 }
  0xee   :  { %v2309_v23 = vpop.permute.xlu1 %402 }
  0xef   :  { %1645 = vmatmul.mubr.msk.f32.gmra.mxu0 %vm540_vm0, %v319_v31  ;;  %v2311_v31 = vpop.permute.xlu0 %397 }
  0xf0   :  { %1647 = vmatprep.mubr.msk.f32.mxu0 %vm540_vm0, %v320_v18 }
  0xf3   :  { %1648 = vmatmul.mubr.msk.f32.gmra.mxu0 %vm540_vm0, %v321_v32 }
  0xf4   :  { %1650 = vmatprep.mubr.msk.f32.mxu0 %vm540_vm0, %v322_v33 }
  0xf7   :  { %1651 = vmatmul.mubr.msk.f32.gmra.mxu0 %vm540_vm0, %v323_v34  ;;  %v2315_v34 = vpop.permute.xlu1 %392 }
  0xf8   :  { %1653 = vmatprep.mubr.msk.f32.mxu0 %vm540_vm0, %v324_v35 }
  0xfb   :  { %1654 = vmatmul.mubr.msk.f32.gmra.mxu0 %vm540_vm0, %v325_v36 }
  0xfc   :  { %1656 = vmatprep.mubr.msk.f32.mxu0 %vm540_vm0, %v326_v37 }
  0xff   :  { %1657 = vmatmul.mubr.msk.f32.gmra.mxu0 %vm540_vm0, %v327_v38 }
 0x100   :  { %1659 = vmatprep.mubr.msk.f32.mxu0 %vm540_vm0, %v328_v39 }
 0x103   :  { %1660 = vmatmul.mubr.msk.f32.gmra.mxu0 %vm540_vm0, %v329_v26 }
 0x104   :  { %1662 = vmatprep.mubr.msk.f32.mxu0 %vm540_vm0, %v330_v27  ;;  %v2325_v27 = vpop.permute.xlu0 %387 }
 0x107   :  { %1663 = vmatmul.mubr.msk.f32.gmra.mxu0 %vm540_vm0, %v331_v40 }
 0x108   :  { %1665 = vmatprep.mubr.msk.f32.mxu0 %vm540_vm0, %v332_v42 }
 0x10b   :  { %1666 = vmatmul.mubr.msk.f32.gmra.mxu0 %vm540_vm0, %v333_v43 }
 0x10c   :  { %1668 = vmatprep.mubr.msk.f32.mxu0 %vm540_vm0, %v334_v49  ;;  %v2331_v49 = vpop.permute.xlu1 %382 }
 0x10f   :  { %1669 = vmatmul.mubr.msk.f32.gmra.mxu0 %vm540_vm0, %v335_v48 }
 0x110   :  { %1671 = vmatprep.mubr.msk.f32.mxu0 %vm540_vm0, %v336_v47 }
 0x113   :  { %1672 = vmatmul.mubr.msk.f32.gmra.mxu0 %vm540_vm0, %v337_v45 }
 0x114   :  { %1674 = vmatprep.mubr.msk.f32.mxu0 %vm540_vm0, %v338_v50 }
 0x117   :  { %1675 = vmatmul.mubr.msk.f32.gmra.mxu0 %vm540_vm0, %v339_v51 }
 0x118   :  { %1677 = vmatprep.mubr.msk.f32.mxu0 %vm540_vm0, %v340_v52 }
 0x11b   :  { %1678 = vmatmul.mubr.msk.f32.gmra.mxu0 %vm540_vm0, %v341_v41  ;;  %v2341_v41 = vpop.permute.xlu0 %537 }
 0x11c   :  { %1680 = vmatprep.mubr.msk.f32.mxu0 %vm540_vm0, %v342_v53 }
 0x11f   :  { %1681 = vmatmul.mubr.msk.f32.gmra.mxu0 %vm540_vm0, %v343_v54 }
 0x120   :  { %1683 = vmatprep.mubr.msk.f32.mxu0 %vm540_vm0, %v344_v55 }
 0x123   :  { %1684 = vmatmul.mubr.msk.f32.gmra.mxu0 %vm540_vm0, %v345_v56  ;;  %v2348_v56 = vpop.permute.xlu1 %532 }
 0x124   :  { %1686 = vmatprep.mubr.msk.f32.mxu0 %vm540_vm0, %v346_v57 }
 0x127   :  { %1687 = vmatmul.mubr.msk.f32.gmra.mxu0 %vm540_vm0, %v347_v58 }
 0x128   :  { %1218 = vmatprep.mubr.f32.mxu0 %v899_v59 }
 0x1ab   :  { %v2293_v63 = vpop.f32.mrf.mxu0 }
 0x1ad   :  { %v2295_v1 = vpop.f32.mrf.mxu0 }
 0x1af   :  { %v2297_v44 = vpop.f32.mrf.mxu0 }
 0x1b1   :  { %v2299_v3 = vpop.f32.mrf.mxu0 }
 0x1b3   :  { %v2301_v5 = vpop.f32.mrf.mxu0 }
 0x1b4   :  { %v733_v58 = vadd.f32 %v2301_v5, %v2307_v46 }
 0x1b5   :  { %v2303_v6 = vpop.f32.mrf.mxu0 }
 0x1b6   :  { %v871_v5 = vmax.f32 %v733_v58, 0.0 }
 0x1b7   :  { %v1652_v7 = vpop.f32.mrf.mxu0 }
 0x1b8   :  { %v743_v51 = vadd.f32 %v1652_v7, %v418_v13 }
 0x1b9   :  { %v2305_v9 = vpop.f32.mrf.mxu0 }
 0x1ba   :  { %v738_v54 = vadd.f32 %v2305_v9, %v413_v15  ;;  %v873_v59 = vmax.f32 %v743_v51, 0.0 }
 0x1bb   :  { %v1655_v11 = vpop.f32.mrf.mxu0 }
 0x1bc   :  { %v753_v42 = vadd.f32 %v1655_v11, %v428_v8 }
 0x1bd   :  { %v747_v12 = vpop.f32.mrf.mxu0 }
 0x1be   :  { %v748_v47 = vadd.f32 %v747_v12, %v423_v10  ;;  %v875_v52 = vmax.f32 %v753_v42, 0.0 }
 0x1bf   :  { %v1658_v14 = vpop.f32.mrf.mxu0 }
 0x1c0   :  { %v763_v36 = vadd.f32 %v1658_v14, %v438_v4  ;;  %v874_v55 = vmax.f32 %v748_v47, 0.0  ;;  %v723_v4 = vadd.f32 %v2297_v44, %v2311_v31  ;;  %v713_v44 = vadd.f32 %v2293_v63, %v2325_v27 }
 0x1c1   :  { %v757_v16 = vpop.f32.mrf.mxu0 }
 0x1c2   :  { %v758_v39 = vadd.f32 %v757_v16, %v433_v22  ;;  %v877_v43 = vmax.f32 %v763_v36, 0.0  ;;  %v523_v22 = vpop.permute.xlu1 %522  ;;  %v869_v10 = vmax.f32 %v723_v4, 0.0  ;;  %v867_v63 = vmax.f32 %v713_v44, 0.0  ;;  %v901_v4 = vld [vmem:[%s2747_s6 + $0x18] sm:$0xff] }
 0x1c3   :  { %v1661_v19 = vpop.f32.mrf.mxu0  ;;  %v905_v44 = vld [vmem:[%s2747_s6 + $0x38] sm:$0xff] }
 0x1c4   :  { %v773_v28 = vadd.f32 %v1661_v19, %v448_v0  ;;  %v876_v45 = vmax.f32 %v758_v39, 0.0  ;;  %v528_v0 = vpop.permute.xlu0 %527 }
 0x1c5   :  { %v767_v20 = vpop.f32.mrf.mxu0 }
 0x1c6   :  { %v768_v32 = vadd.f32 %v767_v20, %v443_v2  ;;  %v879_v37 = vmax.f32 %v773_v28, 0.0  ;;  %v513_v14 = vpop.permute.xlu1 %512 }
 0x1c7   :  { %v1664_v17 = vpop.f32.mrf.mxu0 }
 0x1c8   :  { %v783_v24 = vadd.f32 %v1664_v17, %v458_v61  ;;  %v878_v26 = vmax.f32 %v768_v32, 0.0  ;;  %v728_v61 = vadd.f32 %v2303_v6, %v2309_v23  ;;  %v718_v6 = vadd.f32 %v2299_v3, %v2315_v34  ;;  %v518_v11 = vpop.permute.xlu0 %517 }
 0x1c9   :  { %v777_v25 = vpop.f32.mrf.mxu0  ;;  %v708_v3 = vadd.f32 %v2295_v1, %v2331_v49 }
 0x1ca   :  { %v881_v29 = vmax.f32 %v783_v24, 0.0  ;;  %v778_v30 = vadd.f32 %v777_v25, %v453_v62  ;;  %v872_v62 = vmax.f32 %v738_v54, 0.0  ;;  %v870_v8 = vmax.f32 %v728_v61, 0.0  ;;  %v503_v25 = vpop.permute.xlu1 %502 }
 0x1cb   :  { %v2313_v18 = vpop.f32.mrf.mxu0  ;;  %v868_v13 = vmax.f32 %v718_v6, 0.0  ;;  %v866_v19 = vmax.f32 %v708_v3, 0.0  ;;  %v933_v6 = vld [vmem:[%s2747_s6 + $0x118] sm:$0xff]  ;;  %v907_v3 = vld [vmem:[%s2747_s6 + $0x48] sm:$0xff] }
 0x1cc   :  { %v880_v33 = vmax.f32 %v778_v30, 0.0  ;;  %1155 = vmatpush1.msra.mxu0 %v881_v29  ;;  %1721 = vmatpush1.msra.mxu1 %v881_v29  ;;  %v508_v46 = vpop.permute.xlu0 %507 }
 0x1cd   :  { %v2317_v35 = vpop.f32.mrf.mxu0  ;;  %1156 = vmatprep.subr.mxu0 %v1813_v21  ;;  %1690 = vmatprep.subr.mxu1 %v1813_v21 }
 0x1ce   :  { %1157 = vmatpush1.msra.mxu0 %v880_v33  ;;  %1722 = vmatpush1.msra.mxu1 %v880_v33  ;;  %v493_v36 = vpop.permute.xlu1 %492 }
 0x1cf   :  { %v2321_v38 = vpop.f32.mrf.mxu0  ;;  %1158 = vmatprep.subr.mxu0 %v1813_v21  ;;  %1691 = vmatprep.subr.mxu1 %v1813_v21 }
 0x1d0   :  { %1159 = vmatpush1.msra.mxu0 %v879_v37  ;;  %1723 = vmatpush1.msra.mxu1 %v879_v37  ;;  %v498_v32 = vpop.permute.xlu0 %497 }
 0x1d1   :  { %v2327_v40 = vpop.f32.mrf.mxu0  ;;  %1160 = vmatprep.subr.mxu0 %v1813_v21  ;;  %1692 = vmatprep.subr.mxu1 %v1813_v21 }
 0x1d2   :  { %1161 = vmatpush1.msra.mxu0 %v878_v26  ;;  %1724 = vmatpush1.msra.mxu1 %v878_v26  ;;  %v483_v47 = vpop.permute.xlu1 %482 }
 0x1d3   :  { %v2333_v48 = vpop.f32.mrf.mxu0  ;;  %1162 = vmatprep.subr.mxu0 %v1813_v21  ;;  %1693 = vmatprep.subr.mxu1 %v1813_v21 }
 0x1d4   :  { %1163 = vmatpush1.msra.mxu0 %v877_v43  ;;  %1725 = vmatpush1.msra.mxu1 %v877_v43  ;;  %v488_v42 = vpop.permute.xlu0 %487 }
 0x1d5   :  { %v2337_v50 = vpop.f32.mrf.mxu0  ;;  %1164 = vmatprep.subr.mxu0 %v1813_v21  ;;  %1694 = vmatprep.subr.mxu1 %v1813_v21 }
 0x1d6   :  { %1165 = vmatpush1.msra.mxu0 %v876_v45  ;;  %1726 = vmatpush1.msra.mxu1 %v876_v45  ;;  %v808_v54 = vadd.f32 %v2337_v50, %v483_v47  ;;  %v951_v47 = vld [vmem:[%s2747_s6 + $0x1a8] sm:$0xff] }
 0x1d7   :  { %v2343_v53 = vpop.f32.mrf.mxu0  ;;  %1166 = vmatprep.subr.mxu0 %v1813_v21  ;;  %1695 = vmatprep.subr.mxu1 %v1813_v21 }
 0x1d8   :  { %1167 = vmatpush1.msra.mxu0 %v875_v52  ;;  %1727 = vmatpush1.msra.mxu1 %v875_v52  ;;  %v823_v43 = vadd.f32 %v2343_v53, %v498_v32  ;;  %v813_v52 = vadd.f32 %v2333_v48, %v488_v42  ;;  %v478_v53 = vpop.permute.xlu0 %477  ;;  %v886_v50 = vmax.f32 %v808_v54, 0.0  ;;  %v914_v32 = vld [vmem:[%s2747_s6 + $0x80] sm:$0xff]  ;;  %v952_v54 = vld [vmem:[%s2747_s6 + $0x1b0] sm:$0xff] }
 0x1d9   :  { %v2350_v57 = vpop.f32.mrf.mxu0  ;;  %1168 = vmatprep.subr.mxu0 %v1813_v21  ;;  %1696 = vmatprep.subr.mxu1 %v1813_v21  ;;  %v803_v48 = vadd.f32 %v2321_v38, %v478_v53  ;;  %v918_v42 = vld [vmem:[%s2747_s6 + $0xa0] sm:$0xff] }
 0x1da   :  { %1169 = vmatpush1.msra.mxu0 %v874_v55  ;;  %1728 = vmatpush1.msra.mxu1 %v874_v55  ;;  %v818_v45 = vadd.f32 %v2350_v57, %v493_v36  ;;  %v887_v57 = vmax.f32 %v813_v52, 0.0  ;;  %v947_v36 = vld [vmem:[%s2747_s6 + $0x188] sm:$0xff]  ;;  %v922_v53 = vld [vmem:[%s2747_s6 + $0xc0] sm:$0xff] }
 0x1db   :  { %v2356_v60 = vpop.f32.mrf.mxu0  ;;  %1170 = vmatprep.subr.mxu0 %v1813_v21  ;;  %1697 = vmatprep.subr.mxu1 %v1813_v21  ;;  %v885_v38 = vmax.f32 %v803_v48, 0.0  ;;  %v923_v52 = vld [vmem:[%s2747_s6 + $0xc8] sm:$0xff]  ;;  %v924_v48 = vld [vmem:[%s2747_s6 + $0xd0] sm:$0xff] }
 0x1dc   :  { %1171 = vmatpush1.msra.mxu0 %v873_v59  ;;  %1729 = vmatpush1.msra.mxu1 %v873_v59  ;;  %v833_v37 = vadd.f32 %v2356_v60, %v508_v46  ;;  %v888_v55 = vmax.f32 %v818_v45, 0.0  ;;  %v468_v59 = vpop.permute.xlu0 %467  ;;  %v911_v46 = vld [vmem:[%s2747_s6 + $0x68] sm:$0xff]  ;;  %v920_v45 = vld [vmem:[%s2747_s6 + $0xb0] sm:$0xff] }
 0x1dd   :  { %v2362_v2 = vpop.f32.mrf.mxu0  ;;  %1172 = vmatprep.subr.mxu0 %v1813_v21  ;;  %1698 = vmatprep.subr.mxu1 %v1813_v21  ;;  %v793_v60 = vadd.f32 %v2313_v18, %v468_v59  ;;  %v926_v59 = vld [vmem:[%s2747_s6 + $0xe0] sm:$0xff] }
 0x1de   :  { %1173 = vmatpush1.msra.mxu0 %v872_v62  ;;  %1730 = vmatpush1.msra.mxu1 %v872_v62  ;;  %v828_v26 = vadd.f32 %v2362_v2, %v503_v25  ;;  %v891_v49 = vmax.f32 %v833_v37, 0.0  ;;  %v928_v2 = vld [vmem:[%s2747_s6 + $0xf0] sm:$0xff]  ;;  %v943_v25 = vld [vmem:[%s2747_s6 + $0x168] sm:$0xff] }
 0x1df   :  { %v1682_v7 = vpop.f32.mrf.mxu0  ;;  %1174 = vmatprep.subr.mxu0 %v1813_v21  ;;  %1699 = vmatprep.subr.mxu1 %v1813_v21  ;;  %v916_v37 = vld [vmem:[%s2747_s6 + $0x90] sm:$0xff] }
 0x1e0   :  { %1175 = vmatpush1.msra.mxu0 %v871_v5  ;;  %1731 = vmatpush1.msra.mxu1 %v871_v5  ;;  %v843_v30 = vadd.f32 %v1682_v7, %v518_v11  ;;  %v890_v51 = vmax.f32 %v828_v26, 0.0  ;;  %v931_v5 = vld [vmem:[%s2747_s6 + $0x108] sm:$0xff]  ;;  %v904_v11 = vld [vmem:[%s2747_s6 + $0x30] sm:$0xff] }
 0x1e1   :  { %v837_v9 = vpop.f32.mrf.mxu0  ;;  %1176 = vmatprep.subr.mxu0 %v1813_v21  ;;  %1700 = vmatprep.subr.mxu1 %v1813_v21  ;;  %v903_v7 = vld [vmem:[%s2747_s6 + $0x28] sm:$0xff] }
 0x1e2   :  { %1177 = vmatpush1.msra.mxu0 %v870_v8  ;;  %1732 = vmatpush1.msra.mxu1 %v870_v8  ;;  %v838_v33 = vadd.f32 %v837_v9, %v513_v14  ;;  %v893_v39 = vmax.f32 %v843_v30, 0.0  ;;  %v902_v8 = vld [vmem:[%s2747_s6 + $0x20] sm:$0xff]  ;;  %v932_v9 = vld [vmem:[%s2747_s6 + $0x110] sm:$0xff]  ;;  %v915_v30 = vld [vmem:[%s2747_s6 + $0x88] sm:$0xff] }
 0x1e3   :  { %v1685_v12 = vpop.f32.mrf.mxu0  ;;  %1178 = vmatprep.subr.mxu0 %v1813_v21  ;;  %1701 = vmatprep.subr.mxu1 %v1813_v21  ;;  %v906_v14 = vld [vmem:[%s2747_s6 + $0x40] sm:$0xff]  ;;  %v919_v26 = vld [vmem:[%s2747_s6 + $0xa8] sm:$0xff] }
 0x1e4   :  { %1179 = vmatpush1.msra.mxu0 %v869_v10  ;;  %1733 = vmatpush1.msra.mxu1 %v869_v10  ;;  %v853_v23 = vadd.f32 %v1685_v12, %v528_v0  ;;  %v892_v27 = vmax.f32 %v838_v33, 0.0  ;;  %v883_v0 = vmax.f32 %v793_v60, 0.0  ;;  %v935_v10 = vld [vmem:[%s2747_s6 + $0x128] sm:$0xff]  ;;  %v934_v12 = vld [vmem:[%s2747_s6 + $0x120] sm:$0xff]  ;;  %v944_v33 = vld [vmem:[%s2747_s6 + $0x170] sm:$0xff] }
 0x1e5   :  { %v847_v15 = vpop.f32.mrf.mxu0  ;;  %1180 = vmatprep.subr.mxu0 %v1813_v21  ;;  %1702 = vmatprep.subr.mxu1 %v1813_v21  ;;  %v956_v60 = vld [vmem:[%s2747_s6 + $0x1d0] sm:$0xff] }
 0x1e6   :  { %1181 = vmatpush1.msra.mxu0 %v868_v13  ;;  %1734 = vmatpush1.msra.mxu1 %v868_v13  ;;  %v848_v28 = vadd.f32 %v847_v15, %v523_v22  ;;  %v895_v31 = vmax.f32 %v853_v23, 0.0  ;;  %v900_v22 = vld [vmem:[%s2747_s6 + $0x10] sm:$0xff]  ;;  %v937_v13 = vld [vmem:[%s2747_s6 + $0x138] sm:$0xff]  ;;  %v910_v23 = vld [vmem:[%s2747_s6 + $0x60] sm:$0xff] }
 0x1e7   :  { %v1688_v16 = vpop.f32.mrf.mxu0  ;;  %1182 = vmatprep.subr.mxu0 %v1813_v21  ;;  %1703 = vmatprep.subr.mxu1 %v1813_v21  ;;  %v936_v15 = vld [vmem:[%s2747_s6 + $0x130] sm:$0xff] }
 0x1e8   :  { %v863_v1 = vadd.f32 %v1688_v16, %v2341_v41  ;;  %1183 = vmatpush1.msra.mxu0 %v867_v63  ;;  %1735 = vmatpush1.msra.mxu1 %v867_v63  ;;  %v894_v34 = vmax.f32 %v848_v28, 0.0  ;;  %v889_v41 = vmax.f32 %v823_v43, 0.0  ;;  %v909_v63 = vld [vmem:[%s2747_s6 + $0x58] sm:$0xff]  ;;  %v939_v16 = vld [vmem:[%s2747_s6 + $0x148] sm:$0xff]  ;;  %v912_v28 = vld [vmem:[%s2747_s6 + $0x70] sm:$0xff] }
 0x1e9   :  { %v857_v20 = vpop.f32.mrf.mxu0  ;;  %1184 = vmatprep.subr.mxu0 %v1813_v21  ;;  %1704 = vmatprep.subr.mxu1 %v1813_v21  ;;  %v948_v43 = vld [vmem:[%s2747_s6 + $0x190] sm:$0xff] }
 0x1ea   :  { %v897_v17 = vmax.f32 %v863_v1, 0.0  ;;  %v858_v24 = vadd.f32 %v857_v20, %v2348_v56  ;;  %1185 = vmatpush1.msra.mxu0 %v866_v19  ;;  %1736 = vmatpush1.msra.mxu1 %v866_v19  ;;  %v473_v56 = vpop.permute.xlu1 %472  ;;  %v908_v19 = vld [vmem:[%s2747_s6 + $0x50] sm:$0xff]  ;;  %v938_v1 = vld [vmem:[%s2747_s6 + $0x140] sm:$0xff]  ;;  %v941_v20 = vld [vmem:[%s2747_s6 + $0x158] sm:$0xff] }
 0x1eb   :  { %1186 = vmatprep.subr.mxu0 %v1813_v21  ;;  %1705 = vmatprep.subr.mxu1 %v1813_v21  ;;  %v798_v58 = vadd.f32 %v2327_v40, %v473_v56  ;;  %v955_v56 = vld [vmem:[%s2747_s6 + $0x1c8] sm:$0xff] }
 0x1ec   :  { %v896_v29 = vmax.f32 %v858_v24, 0.0  ;;  %1187 = vmatpush2.msra.mxu0 %v897_v17  ;;  %1737 = vmatpush2.msra.mxu1 %v897_v17  ;;  %v940_v17 = vld [vmem:[%s2747_s6 + $0x150] sm:$0xff]  ;;  %v913_v24 = vld [vmem:[%s2747_s6 + $0x78] sm:$0xff] }
 0x1ed   :  { %1188 = vmatprep.subr.mxu0 %v1813_v21  ;;  %1706 = vmatprep.subr.mxu1 %v1813_v21  ;;  %v884_v62 = vmax.f32 %v798_v58, 0.0  ;;  %v927_v58 = vld [vmem:[%s2747_s6 + $0xe8] sm:$0xff] }
 0x1ee   :  { %1189 = vmatpush2.msra.mxu0 %v896_v29  ;;  %1738 = vmatpush2.msra.mxu1 %v896_v29  ;;  %v463_v61 = vpop.permute.xlu1 %462  ;;  %v942_v29 = vld [vmem:[%s2747_s6 + $0x160] sm:$0xff] }
 0x1ef   :  { %1190 = vmatprep.subr.mxu0 %v1813_v21  ;;  %1707 = vmatprep.subr.mxu1 %v1813_v21  ;;  %v788_v40 = vadd.f32 %v2317_v35, %v463_v61  ;;  %v898_v35 = vld [vmem:[%s2747_s6] sm:$0xff] }
 0x1f0   :  { %1191 = vmatpush2.msra.mxu0 %v895_v31  ;;  %1739 = vmatpush2.msra.mxu1 %v895_v31  ;;  %v945_v31 = vld [vmem:[%s2747_s6 + $0x178] sm:$0xff]  ;;  %v958_v61 = vld [vmem:[%s2747_s6 + $0x1e0] sm:$0xff] }
 0x1f1   :  { %1192 = vmatprep.subr.mxu0 %v1813_v21  ;;  %1708 = vmatprep.subr.mxu1 %v1813_v21  ;;  %v882_v18 = vmax.f32 %v788_v40, 0.0  ;;  %v961_v40 = vld [vmem:[%s2747_s6 + $0x1f8] sm:$0xff] }
 0x1f2   :  { %1193 = vmatpush2.msra.mxu0 %v894_v34  ;;  %1740 = vmatpush2.msra.mxu1 %v894_v34  ;;  %v917_v34 = vld [vmem:[%s2747_s6 + $0x98] sm:$0xff] }
 0x1f3   :  { %1194 = vmatprep.subr.mxu0 %v1813_v21  ;;  %1709 = vmatprep.subr.mxu1 %v1813_v21 }
 0x1f4   :  { %1195 = vmatpush2.msra.mxu0 %v893_v39  ;;  %1741 = vmatpush2.msra.mxu1 %v893_v39  ;;  %v946_v39 = vld [vmem:[%s2747_s6 + $0x180] sm:$0xff] }
 0x1f5   :  { %1196 = vmatprep.subr.mxu0 %v1813_v21  ;;  %1710 = vmatprep.subr.mxu1 %v1813_v21 }
 0x1f6   :  { %1197 = vmatpush2.msra.mxu0 %v892_v27  ;;  %1742 = vmatpush2.msra.mxu1 %v892_v27  ;;  %v949_v27 = vld [vmem:[%s2747_s6 + $0x198] sm:$0xff] }
 0x1f7   :  { %1198 = vmatprep.subr.mxu0 %v1813_v21  ;;  %1711 = vmatprep.subr.mxu1 %v1813_v21 }
 0x1f8   :  { %1199 = vmatpush2.msra.mxu0 %v891_v49  ;;  %1743 = vmatpush2.msra.mxu1 %v891_v49  ;;  %v921_v49 = vld [vmem:[%s2747_s6 + $0xb8] sm:$0xff] }
 0x1f9   :  { %1200 = vmatprep.subr.mxu0 %v1813_v21  ;;  %1712 = vmatprep.subr.mxu1 %v1813_v21 }
 0x1fa   :  { %1201 = vmatpush2.msra.mxu0 %v890_v51  ;;  %1744 = vmatpush2.msra.mxu1 %v890_v51  ;;  %v950_v51 = vld [vmem:[%s2747_s6 + $0x1a0] sm:$0xff] }
 0x1fb   :  { %1202 = vmatprep.subr.mxu0 %v1813_v21  ;;  %1713 = vmatprep.subr.mxu1 %v1813_v21 }
 0x1fc   :  { %1203 = vmatpush2.msra.mxu0 %v889_v41  ;;  %1745 = vmatpush2.msra.mxu1 %v889_v41  ;;  %v953_v41 = vld [vmem:[%s2747_s6 + $0x1b8] sm:$0xff] }
 0x1fd   :  { %1204 = vmatprep.subr.mxu0 %v1813_v21  ;;  %1714 = vmatprep.subr.mxu1 %v1813_v21 }
 0x1fe   :  { %1205 = vmatpush2.msra.mxu0 %v888_v55  ;;  %1746 = vmatpush2.msra.mxu1 %v888_v55  ;;  %v925_v55 = vld [vmem:[%s2747_s6 + $0xd8] sm:$0xff] }
 0x1ff   :  { %1206 = vmatprep.subr.mxu0 %v1813_v21  ;;  %1715 = vmatprep.subr.mxu1 %v1813_v21 }
 0x200   :  { %1207 = vmatpush2.msra.mxu0 %v887_v57  ;;  %1747 = vmatpush2.msra.mxu1 %v887_v57  ;;  %v954_v57 = vld [vmem:[%s2747_s6 + $0x1c0] sm:$0xff] }
 0x201   :  { %1208 = vmatprep.subr.mxu0 %v1813_v21  ;;  %1716 = vmatprep.subr.mxu1 %v1813_v21 }
 0x202   :  { %1209 = vmatpush2.msra.mxu0 %v886_v50  ;;  %1748 = vmatpush2.msra.mxu1 %v886_v50  ;;  %v957_v50 = vld [vmem:[%s2747_s6 + $0x1d8] sm:$0xff] }
 0x203   :  { %1210 = vmatprep.subr.mxu0 %v1813_v21  ;;  %1717 = vmatprep.subr.mxu1 %v1813_v21 }
 0x204   :  { %1211 = vmatpush2.msra.mxu0 %v885_v38  ;;  %1749 = vmatpush2.msra.mxu1 %v885_v38  ;;  %v959_v38 = vld [vmem:[%s2747_s6 + $0x1e8] sm:$0xff] }
 0x205   :  { %1212 = vmatprep.subr.mxu0 %v1813_v21  ;;  %1718 = vmatprep.subr.mxu1 %v1813_v21 }
 0x206   :  { %1213 = vmatpush2.msra.mxu0 %v884_v62  ;;  %1750 = vmatpush2.msra.mxu1 %v884_v62  ;;  %v960_v62 = vld [vmem:[%s2747_s6 + $0x1f0] sm:$0xff] }
 0x207   :  { %1214 = vmatprep.subr.mxu0 %v1813_v21  ;;  %1719 = vmatprep.subr.mxu1 %v1813_v21 }
 0x208   :  { %1215 = vmatpush2.msra.mxu0 %v883_v0  ;;  %1751 = vmatpush2.msra.mxu1 %v883_v0  ;;  %v1418_v0 = vlaneseq }
 0x209   :  { %1216 = vmatprep.subr.mxu0 %v1813_v21  ;;  %1720 = vmatprep.subr.mxu1 %v1813_v21  ;;  %v930_v21 = vld [vmem:[%s2747_s6 + $0x100] sm:$0xff]  ;;  %s1814_s6 = smov [#allocation3]  }
 0x20a   :  { %1217 = vmatpush2.msra.mxu0 %v882_v18  ;;  %1752 = vmatpush2.msra.mxu1 %v882_v18  ;;  %v2616_v18 = vshrl.u32 %v1418_v0, 7 }
 0x20b   :  { %1219 = vmatmul.mubr.f32.vlgmr.msra.gmra.mxu0 %v898_v35  ;;  %1294 = vmatmul.mubr.f32.vlgmr.msra.gmra.mxu1 %v928_v2  ;;  %v2621_v35 = vld [vmem:[%s2749_s8] sm:$0x3]  ;;  %s1516_s8 = sshll.u32 %s1814_s6, 4  ;;  %s1517_s8 = int_to_ptr.vmem [resolvable:$true] %s1516_s8 }
 0x20c   :  { %1223 = vmatprep.mubr.f32.mxu0 %v901_v4  ;;  %1298 = vmatprep.mubr.f32.mxu1 %v931_v5  ;;  %2754 = vst [vmem:[#allocation6_spill] sm:$0xff] %v2616_v18  ;;  %2755 = vst [vmem:[#allocation7_spill] sm:$0xff] %v2621_v35  ;;  %v1429_v2 = vsub.s32 1, %v2616_v18  ;;  %s1784_s11 = scalar_lea.vmem %s1517_s8, 16  ;;  %s1788_s12 = scalar_lea.vmem %s1517_s8, 32 }
 0x20d   :  { %p1785_p0 = scmp.ne.s32.totalorder %s1517_s8, %s1784_s11  ;;  %p1789_p1 = scmp.lt.s32.totalorder %s1517_s8, %s1517_s8 }
 0x20e   :  { %v1430_v4 = vrot.slane %v2621_v35, %v1429_v2  ;;  %p1790_p2 = scmp.lt.s32.totalorder %s1788_s12, %s1784_s11 }
 0x20f   :  { %1224 = vmatmul.mubr.f32.gmra.mxu0 %v900_v22  ;;  %1299 = vmatmul.mubr.f32.gmra.mxu1 %v930_v21  ;;  %v2629_v21 = vpop.permute.xlu0 %1151 }
 0x210   :  { %1228 = vmatprep.mubr.f32.mxu0 %v903_v7  ;;  %1303 = vmatprep.mubr.f32.mxu1 %v933_v6  ;;  %p1791_p3 = por %p1790_p2, %p1789_p1 }
 0x212   :  { %p1792_p4 = pnand %p1791_p3, %p1785_p0 }
 0x213   :  { %1229 = vmatmul.mubr.f32.gmra.mxu0 %v902_v8  ;;  %1304 = vmatmul.mubr.f32.gmra.mxu1 %v932_v9  ;;  %v2631_v8 = vpop.permute.xlu1 %1071 }
 0x214   :  { %1233 = vmatprep.mubr.f32.mxu0 %v905_v44  ;;  %1308 = vmatprep.mubr.f32.mxu1 %v935_v10 }
 0x217   :  { %1234 = vmatmul.mubr.f32.gmra.mxu0 %v904_v11  ;;  %1309 = vmatmul.mubr.f32.gmra.mxu1 %v934_v12  ;;  %v2637_v12 = vpop.permute.xlu0 %1146 }
 0x218   :  { %1238 = vmatprep.mubr.f32.mxu0 %v907_v3  ;;  %1313 = vmatprep.mubr.f32.mxu1 %v937_v13 }
 0x21b   :  { %1239 = vmatmul.mubr.f32.gmra.mxu0 %v906_v14  ;;  %1314 = vmatmul.mubr.f32.gmra.mxu1 %v936_v15  ;;  %v2643_v14 = vpop.permute.xlu1 %1066 }
 0x21c   :  { %1243 = vmatprep.mubr.f32.mxu0 %v909_v63  ;;  %1318 = vmatprep.mubr.f32.mxu1 %v939_v16 }
 0x21f   :  { %1244 = vmatmul.mubr.f32.gmra.mxu0 %v908_v19  ;;  %1319 = vmatmul.mubr.f32.gmra.mxu1 %v938_v1  ;;  %v2649_v1 = vpop.permute.xlu0 %1141 }
 0x220   :  { %1248 = vmatprep.mubr.f32.mxu0 %v911_v46  ;;  %1323 = vmatprep.mubr.f32.mxu1 %v941_v20 }
 0x223   :  { %1249 = vmatmul.mubr.f32.gmra.mxu0 %v910_v23  ;;  %1324 = vmatmul.mubr.f32.gmra.mxu1 %v940_v17  ;;  %v2651_v23 = vpop.permute.xlu1 %1061 }
 0x224   :  { %1253 = vmatprep.mubr.f32.mxu0 %v913_v24  ;;  %1328 = vmatprep.mubr.f32.mxu1 %v943_v25 }
 0x227   :  { %1254 = vmatmul.mubr.f32.gmra.mxu0 %v912_v28  ;;  %1329 = vmatmul.mubr.f32.gmra.mxu1 %v942_v29  ;;  %v2657_v29 = vpop.permute.xlu0 %1136 }
 0x228   :  { %1258 = vmatprep.mubr.f32.mxu0 %v915_v30  ;;  %1333 = vmatprep.mubr.f32.mxu1 %v945_v31 }
 0x22b   :  { %1259 = vmatmul.mubr.f32.gmra.mxu0 %v914_v32  ;;  %1334 = vmatmul.mubr.f32.gmra.mxu1 %v944_v33  ;;  %v2663_v32 = vpop.permute.xlu1 %1056 }
 0x22c   :  { %1263 = vmatprep.mubr.f32.mxu0 %v917_v34  ;;  %1338 = vmatprep.mubr.f32.mxu1 %v947_v36 }
 0x22f   :  { %1264 = vmatmul.mubr.f32.gmra.mxu0 %v916_v37  ;;  %1339 = vmatmul.mubr.f32.gmra.mxu1 %v946_v39  ;;  %v2669_v39 = vpop.permute.xlu0 %1131 }
 0x230   :  { %1268 = vmatprep.mubr.f32.mxu0 %v919_v26  ;;  %1343 = vmatprep.mubr.f32.mxu1 %v949_v27 }
 0x233   :  { %1269 = vmatmul.mubr.f32.gmra.mxu0 %v918_v42  ;;  %1344 = vmatmul.mubr.f32.gmra.mxu1 %v948_v43  ;;  %v2671_v42 = vpop.permute.xlu1 %1051 }
 0x234   :  { %1273 = vmatprep.mubr.f32.mxu0 %v921_v49  ;;  %1348 = vmatprep.mubr.f32.mxu1 %v951_v47 }
 0x237   :  { %1274 = vmatmul.mubr.f32.gmra.mxu0 %v920_v45  ;;  %1349 = vmatmul.mubr.f32.gmra.mxu1 %v950_v51  ;;  %v2677_v51 = vpop.permute.xlu0 %1126 }
 0x238   :  { %1278 = vmatprep.mubr.f32.mxu0 %v923_v52  ;;  %1353 = vmatprep.mubr.f32.mxu1 %v953_v41 }
 0x23b   :  { %1279 = vmatmul.mubr.f32.gmra.mxu0 %v922_v53  ;;  %1354 = vmatmul.mubr.f32.gmra.mxu1 %v952_v54  ;;  %v2683_v53 = vpop.permute.xlu1 %1046 }
 0x23c   :  { %1283 = vmatprep.mubr.f32.mxu0 %v925_v55  ;;  %1358 = vmatprep.mubr.f32.mxu1 %v955_v56 }
 0x23f   :  { %1284 = vmatmul.mubr.f32.gmra.mxu0 %v924_v48  ;;  %1359 = vmatmul.mubr.f32.gmra.mxu1 %v954_v57  ;;  %v2689_v57 = vpop.permute.xlu0 %1121 }
 0x240   :  { %1288 = vmatprep.mubr.f32.mxu0 %v927_v58  ;;  %1363 = vmatprep.mubr.f32.mxu1 %v957_v50 }
 0x243   :  { %1289 = vmatmul.mubr.f32.gmra.mxu0 %v926_v59  ;;  %1364 = vmatmul.mubr.f32.gmra.mxu1 %v956_v60  ;;  %v2691_v59 = vpop.permute.xlu1 %1041 }
 0x244   :  { %1368 = vmatprep.mubr.f32.mxu1 %v959_v38  ;;  %1497 = vmatprep.mubr.f32.mxu0 %v1430_v4 }
 0x247   :  { %1369 = vmatmul.mubr.f32.gmra.mxu1 %v958_v61  ;;  %v2695_v4 = vpop.permute.xlu1 %1036 }
 0x248   :  { %1373 = vmatprep.mubr.f32.mxu1 %v961_v40 }
 0x24b   :  { %1374 = vmatmul.mubr.f32.gmra.mxu1 %v960_v62  ;;  %v2693_v62 = vpop.permute.xlu0 %1116 }
 0x2cb   :  { %v2625_v5 = vpop.f32.mrf.mxu0  ;;  %v2627_v22 = vpop.f32.mrf.mxu1 }
 0x2cc   :  { %2756 = vst [vmem:[#allocation8_spill] sm:$0xff] %v2625_v5 }
 0x2cd   :  { %v1222_v7 = vpop.f32.mrf.mxu0  ;;  %v1297_v6 = vpop.f32.mrf.mxu1 }
 0x2cf   :  { %v2633_v9 = vpop.f32.mrf.mxu0  ;;  %v2635_v44 = vpop.f32.mrf.mxu1 }
 0x2d0   :  { %2757 = vst [vmem:[#allocation9_spill] sm:$0xff] %v2633_v9  ;;  %2758 = vst [vmem:[#allocation10_spill] sm:$0xff] %v2635_v44 }
 0x2d1   :  { %v1227_v10 = vpop.f32.mrf.mxu0  ;;  %v1302_v11 = vpop.f32.mrf.mxu1 }
 0x2d3   :  { %v2639_v3 = vpop.f32.mrf.mxu0  ;;  %v2641_v13 = vpop.f32.mrf.mxu1 }
 0x2d5   :  { %v1232_v15 = vpop.f32.mrf.mxu0  ;;  %v1307_v63 = vpop.f32.mrf.mxu1 }
 0x2d6   :  { %v1112_v15 = vpop.permute.xlu0 %1111 }
 0x2d7   :  { %v2645_v16 = vpop.f32.mrf.mxu0  ;;  %v2647_v19 = vpop.f32.mrf.mxu1 }
 0x2d9   :  { %v1237_v46 = vpop.f32.mrf.mxu0  ;;  %v1312_v20 = vpop.f32.mrf.mxu1 }
 0x2da   :  { %v2697_v20 = vpop.permute.xlu1 %1031 }
 0x2db   :  { %v2653_v17 = vpop.f32.mrf.mxu0  ;;  %v2655_v24 = vpop.f32.mrf.mxu1 }
 0x2dd   :  { %v1242_v25 = vpop.f32.mrf.mxu0  ;;  %v1317_v28 = vpop.f32.mrf.mxu1 }
 0x2df   :  { %v2659_v30 = vpop.f32.mrf.mxu0  ;;  %v2661_v31 = vpop.f32.mrf.mxu1 }
 0x2e1   :  { %v1247_v33 = vpop.f32.mrf.mxu0  ;;  %v1322_v34 = vpop.f32.mrf.mxu1 }
 0x2e3   :  { %v2665_v36 = vpop.f32.mrf.mxu0  ;;  %v2667_v37 = vpop.f32.mrf.mxu1 }
 0x2e5   :  { %v1252_v26 = vpop.f32.mrf.mxu0  ;;  %v1327_v27 = vpop.f32.mrf.mxu1 }
 0x2e6   :  { %v1107_v26 = vpop.permute.xlu0 %1106 }
 0x2e7   :  { %v2673_v43 = vpop.f32.mrf.mxu0  ;;  %v2675_v49 = vpop.f32.mrf.mxu1 }
 0x2e9   :  { %v1257_v47 = vpop.f32.mrf.mxu0  ;;  %v1332_v45 = vpop.f32.mrf.mxu1 }
 0x2ea   :  { %v1027_v45 = vpop.permute.xlu1 %1026 }
 0x2eb   :  { %v2679_v52 = vpop.f32.mrf.mxu0  ;;  %v2681_v41 = vpop.f32.mrf.mxu1 }
 0x2ed   :  { %v1262_v54 = vpop.f32.mrf.mxu0  ;;  %v1337_v55 = vpop.f32.mrf.mxu1 }
 0x2ef   :  { %v2685_v56 = vpop.f32.mrf.mxu0  ;;  %v2687_v48 = vpop.f32.mrf.mxu1 }
 0x2f1   :  { %v1267_v58 = vpop.f32.mrf.mxu0  ;;  %v1342_v50 = vpop.f32.mrf.mxu1 }
 0x2f2   :  { %v1102_v50 = vpop.permute.xlu0 %1101 }
 0x2f3   :  { %v1270_v60 = vpop.f32.mrf.mxu0  ;;  %v1345_v38 = vpop.f32.mrf.mxu1 }
 0x2f5   :  { %v1272_v61 = vpop.f32.mrf.mxu0  ;;  %v1347_v40 = vpop.f32.mrf.mxu1 }
 0x2f6   :  { %v1022_v40 = vpop.permute.xlu1 %1021 }
 0x2f7   :  { %v1275_v0 = vpop.f32.mrf.mxu0  ;;  %v1350_v2 = vpop.f32.mrf.mxu1 }
 0x2f9   :  { %v1277_v7 = vpop.f32.mrf.mxu0  ;;  %v1352_v6 = vpop.f32.mrf.mxu1 }
 0x2fa   :  { %v1296_v7 = vadd.f32 %v2627_v22, %v2631_v8 }
 0x2fb   :  { %v1280_v10 = vpop.f32.mrf.mxu0  ;;  %v1355_v11 = vpop.f32.mrf.mxu1 }
 0x2fc   :  { %v1281_v22 = vadd.f32 %v1280_v10, %v2663_v32  ;;  %v1346_v10 = vadd.f32 %v1345_v38, %v2689_v57 }
 0x2fd   :  { %v1282_v63 = vpop.f32.mrf.mxu0  ;;  %v1357_v46 = vpop.f32.mrf.mxu1 }
 0x2ff   :  { %v1285_v25 = vpop.f32.mrf.mxu0  ;;  %v1360_v28 = vpop.f32.mrf.mxu1 }
 0x300   :  { %v1286_v5 = vadd.f32 %v1285_v25, %v2651_v23  ;;  %v1361_v44 = vadd.f32 %v1360_v28, %v2657_v29  ;;  %v1271_v29 = vadd.f32 %v1270_v60, %v2683_v53  ;;  %v1404_v53 = vmax.f32 %v1346_v10, 0.0 }
 0x301   :  { %v1287_v33 = vpop.f32.mrf.mxu0  ;;  %v1362_v34 = vpop.f32.mrf.mxu1 }
 0x302   :  { %v1407_v23 = vmax.f32 %v1361_v44, 0.0 }
 0x303   :  { %v1290_v27 = vpop.f32.mrf.mxu0  ;;  %v1365_v47 = vpop.f32.mrf.mxu1 }
 0x304   :  { %v1291_v33 = vadd.f32 %v1290_v27, %v2643_v14  ;;  %v1366_v35 = vadd.f32 %v1365_v47, %v2649_v1  ;;  %v1276_v14 = vadd.f32 %v1275_v0, %v2671_v42  ;;  %v1392_v1 = vmax.f32 %v1286_v5, 0.0 }
 0x305   :  { %v1367_v54 = vpop.f32.mrf.mxu1  ;;  %v1292_v55 = vpop.f32.mrf.mxu0  ;;  %v1351_v27 = vadd.f32 %v1350_v2, %v2677_v51  ;;  %v1341_v5 = vadd.f32 %v2687_v48, %v2693_v62  ;;  %v1389_v42 = vmax.f32 %v1271_v29, 0.0  ;;  %v1336_v51 = vadd.f32 %v2681_v41, %v1112_v15 }
 0x306   :  { %v1097_v54 = vpop.permute.xlu0 %1096  ;;  %v1394_v55 = vmax.f32 %v1296_v7, 0.0  ;;  %v1393_v8 = vmax.f32 %v1291_v33, 0.0  ;;  %v1331_v48 = vadd.f32 %v2675_v49, %v1107_v26  ;;  %v1251_v62 = vadd.f32 %v2665_v36, %v1027_v45 }
 0x307   :  { %v1370_v58 = vpop.f32.mrf.mxu1  ;;  %v1405_v44 = vmax.f32 %v1351_v27, 0.0  ;;  %v1403_v38 = vmax.f32 %v1341_v5, 0.0  ;;  %v1326_v0 = vadd.f32 %v2667_v37, %v1102_v50  ;;  %v1402_v41 = vmax.f32 %v1336_v51, 0.0 }
 0x308   :  { %v1371_v63 = vadd.f32 %v1370_v58, %v2637_v12  ;;  %v1408_v12 = vmax.f32 %v1366_v35, 0.0  ;;  %v1266_v35 = vadd.f32 %v2685_v56, %v2691_v59  ;;  %v1256_v56 = vadd.f32 %v2673_v43, %v2697_v20 }
 0x309   :  { %v1372_v61 = vpop.f32.mrf.mxu1  ;;  %v1246_v2 = vadd.f32 %v2659_v30, %v1022_v40  ;;  %v1321_v43 = vadd.f32 %v2661_v31, %v1097_v54  ;;  %v1385_v20 = vmax.f32 %v1251_v62, 0.0  ;;  %v1400_v47 = vmax.f32 %v1326_v0, 0.0 }
 0x30a   :  { %v1017_v61 = vpop.permute.xlu1 %1016  ;;  %v1409_v9 = vmax.f32 %v1371_v63, 0.0  ;;  %v1092_v25 = vpop.permute.xlu0 %1091  ;;  %v1388_v59 = vmax.f32 %v1266_v35, 0.0 }
 0x30b   :  { %v1375_v6 = vpop.f32.mrf.mxu1  ;;  %v1241_v49 = vadd.f32 %v2653_v17, %v1017_v61  ;;  %v1316_v26 = vadd.f32 %v2655_v24, %v1092_v25  ;;  %v1384_v45 = vmax.f32 %v1246_v2, 0.0  ;;  %v1399_v58 = vmax.f32 %v1321_v43, 0.0  ;;  %v2759_v24 = vld [vmem:[#allocation9_spill] sm:$0xff] }
 0x30c   :  { %v1376_v46 = vadd.f32 %v1375_v6, %v2629_v21  ;;  %v1356_v21 = vadd.f32 %v1355_v11, %v2669_v39  ;;  %v1261_v39 = vadd.f32 %v2679_v52, %v2695_v4  ;;  %v1386_v4 = vmax.f32 %v1256_v56, 0.0 }
 0x30d   :  { %v1377_v34 = vpop.f32.mrf.mxu1  ;;  %v1401_v11 = vmax.f32 %v1331_v48, 0.0  ;;  %v1383_v50 = vmax.f32 %v1241_v49, 0.0  ;;  %v1398_v40 = vmax.f32 %v1316_v26, 0.0 }
 0x30e   :  { %v1410_v18 = vmax.f32 %v1376_v46, 0.0  ;;  %v1012_v32 = vpop.permute.xlu1 %1011  ;;  %v1406_v28 = vmax.f32 %v1356_v21, 0.0  ;;  %v1087_v57 = vpop.permute.xlu0 %1086  ;;  %v1387_v52 = vmax.f32 %v1261_v39, 0.0  ;;  %v2760_v46 = vld [vmem:[#allocation10_spill] sm:$0xff] }
 0x30f   :  { %v1236_v37 = vadd.f32 %v2645_v16, %v1012_v32  ;;  %v1311_v30 = vadd.f32 %v2647_v19, %v1087_v57  ;;  %v2761_v19 = vld [vmem:[#allocation8_spill] sm:$0xff] }
 0x310   :  { %1602 = vmatprep.subr.mxu0 %v1410_v18  ;;  %v1391_v18 = vmax.f32 %v1281_v22, 0.0 }
 0x311   :  { %1603 = vmatpush3.msra.mxu0 %v1394_v55  ;;  %v1382_v63 = vmax.f32 %v1236_v37, 0.0  ;;  %v1397_v34 = vmax.f32 %v1311_v30, 0.0 }
 0x312   :  { %1604 = vmatprep.subr.mxu0 %v1409_v9  ;;  %v1390_v9 = vmax.f32 %v1276_v14, 0.0  ;;  %v1007_v60 = vpop.permute.xlu1 %1006  ;;  %v1082_v15 = vpop.permute.xlu0 %1081 }
 0x313   :  { %1605 = vmatpush3.msra.mxu0 %v1393_v8  ;;  %v1231_v31 = vadd.f32 %v2639_v3, %v1007_v60  ;;  %v1306_v17 = vadd.f32 %v2641_v13, %v1082_v15  ;;  %v2762_v3 = vld [vmem:[#allocation6_spill] sm:$0xff]  ;;  %v2763_v8 = vld [vmem:[#allocation7_spill] sm:$0xff] }
 0x314   :  { %1606 = vmatprep.subr.mxu0 %v1408_v12  ;;  %v1420_v61 = vsub.s32 0, %v2762_v3 }
 0x315   :  { %1607 = vmatpush3.msra.mxu0 %v1392_v1  ;;  %v1381_v55 = vmax.f32 %v1231_v31, 0.0  ;;  %v1396_v22 = vmax.f32 %v1306_v17, 0.0 }
 0x316   :  { %1608 = vmatprep.subr.mxu0 %v1407_v23  ;;  %v1002_v36 = vpop.permute.xlu1 %1001  ;;  %v1077_v7 = vpop.permute.xlu0 %1076  ;;  %v1426_v21 = vrot.slane %v2763_v8, %v1420_v61 }
 0x317   :  { %1609 = vmatpush3.msra.mxu0 %v1391_v18  ;;  %v1226_v6 = vadd.f32 %v2759_v24, %v1002_v36  ;;  %v1301_v33 = vadd.f32 %v2760_v46, %v1077_v7 }
 0x318   :  { %1610 = vmatprep.subr.mxu0 %v1406_v28 }
 0x319   :  { %1611 = vmatpush3.msra.mxu0 %v1390_v9  ;;  %v1380_v13 = vmax.f32 %v1226_v6, 0.0  ;;  %v1395_v12 = vmax.f32 %v1301_v33, 0.0 }
 0x31a   :  { %1612 = vmatprep.subr.mxu0 %v1405_v44  ;;  %v997_v16 = vpop.permute.xlu1 %996  ;;  %v1416_v1 = vpop.permute.xlu0 %1415 }
 0x31b   :  { %1613 = vmatpush3.msra.mxu0 %v1389_v42  ;;  %v1221_v54 = vadd.f32 %v2761_v19, %v997_v16  ;;  %v1421_v25 = vrot.slane %v1416_v1, %v1420_v61 }
 0x31c   :  { %1614 = vmatprep.subr.mxu0 %v1404_v53 }
 0x31d   :  { %1615 = vmatpush3.msra.mxu0 %v1388_v59  ;;  %v1379_v14 = vmax.f32 %v1221_v54, 0.0 }
 0x31e   :  { %1616 = vmatprep.subr.mxu0 %v1403_v38 }
 0x31f   :  { %1617 = vmatpush3.msra.mxu0 %v1387_v52 }
 0x320   :  { %1618 = vmatprep.subr.mxu0 %v1402_v41 }
 0x321   :  { %1619 = vmatpush3.msra.mxu0 %v1386_v4 }
 0x322   :  { %1620 = vmatprep.subr.mxu0 %v1401_v11 }
 0x323   :  { %1621 = vmatpush3.msra.mxu0 %v1385_v20 }
 0x324   :  { %1622 = vmatprep.subr.mxu0 %v1400_v47 }
 0x325   :  { %1623 = vmatpush3.msra.mxu0 %v1384_v45 }
 0x326   :  { %1624 = vmatprep.subr.mxu0 %v1399_v58 }
 0x327   :  { %1625 = vmatpush3.msra.mxu0 %v1383_v50 }
 0x328   :  { %1626 = vmatprep.subr.mxu0 %v1398_v40 }
 0x329   :  { %1627 = vmatpush3.msra.mxu0 %v1382_v63 }
 0x32a   :  { %1628 = vmatprep.subr.mxu0 %v1397_v34 }
 0x32b   :  { %1629 = vmatpush3.msra.mxu0 %v1381_v55 }
 0x32c   :  { %1630 = vmatprep.subr.mxu0 %v1396_v22 }
 0x32d   :  { %1631 = vmatpush3.msra.mxu0 %v1380_v13 }
 0x32e   :  { %1632 = vmatprep.subr.mxu0 %v1395_v12 }
 0x32f   :  { %1633 = vmatpush3.msra.mxu0 %v1379_v14 }
 0x330   :  { %1498 = vmatmul.mubr.f32.vlgmr.msra.gmra.mxu0 %v1426_v21 }
 0x3f0   :  { %v1634_v27 = vpop.f32.mrf.mxu0 }
 0x3f2   :  { %v1635_v23 = vpop.f32.mrf.mxu0 }
 0x3f3   :  { %v1636_v29 = vadd.f32 %v1635_v23, %v1634_v27 }
 0x3f5   :  { %v1500_v18 = vadd.f32 %v1636_v29, %v1421_v25 }
 0x3f7   :  { %v1567_v32 = vmul.f32 -1.442695, %v1500_v18 }
 0x3f9   :  { %1780 = vpow2.f32 %v1567_v32 }
 0x406   :  { %v1781_v10 = vpop.eup %1780 }
 0x407   :  { %v1506_v28 = vadd.f32 1.0, %v1781_v10 }
 0x409   :  { %1782 = vrcp.f32 %v1506_v28 }
 0x416   :  { %v1783_v35 = vpop.eup %1782 }
 0x417   :  { %1509 = vst [vmem:[#allocation3] sm:$0x1] %v1783_v35 }
 0x418   :  { %1795 = shalt.err (!%p1792_p4)
}
 0x419   :  { %1519 = dma.vmem_to_hbm [thread:$0]  %s1517_s8, 16, %s2751_s10, [#allocation4]  }
 0x41a   :  { %1804 = dma.done.wait [#allocation4], 16  }
 0x41b   :  { %1805 = vsyncadd [#allocation4], 4294967280 }
 0x41c   :  { %1523 = vsyncpa [#allocation4], 1 }

</bundles_post_ra>
